<compile_context>
chip_gen: v7x
topology: tpu7x:2x2x1
jax: 0.10.0
libtpu: 0.0.40
codegen_flags: <defaults>
</compile_context>

<pallas_src>
import functools

import jax
import jax.numpy as jnp
from jax.experimental import pallas as pl
from jax.experimental.pallas import tpu as pltpu

EPS = 1e-5  # nn.InstanceNorm2d default eps


def _vmem_limit_bytes():
    """Per-generation VMEM budget — never request all of v7x's 64 MiB physical VMEM."""
    try:
        cap = int(getattr(pltpu.get_tpu_info(), "vmem_capacity_bytes", 0)) or (64 << 20)
    except Exception:
        cap = 64 << 20
    return int(min(cap * 3 // 4, 100 << 20))


def spade_kernel(x_ref, idc_ref, idt_ref, idb_ref, w_ref, b_ref, o_ref,
                 pad_ref, sum_ref, ssq_ref, *, inv_count):
    # x_ref  : (1, TH, W, Cin)  f32   tile of the tensor to be instance-normalized
    # idc_ref: (1, TH, W, Cin)  bf16  matching tile of the conditioning ("identity") tensor
    # idt_ref: (1, 1, W, Cin)   bf16  row just ABOVE the tile (clamped; zeroed at ht == 0)
    # idb_ref: (1, 1, W, Cin)   bf16  row just BELOW the tile (clamped; zeroed at last ht)
    # w_ref  : (9, Cin, 2*Cout) bf16  fused conv taps: [..., :Cout]=weight, [..., Cout:]=bias
    # b_ref  : (1, 2*Cout)      f32   fused conv biases
    # o_ref  : (1, TH, W, Cout) f32
    # pad_ref: VMEM (TH+2, Wp, Cin) f32  halo-padded identity tile (Wp = W+2 rounded to 8)
    # sum_ref/ssq_ref: VMEM (1, 1, Cin) f32  streaming instance-norm statistics
    p = pl.program_id(1)
    ht = pl.program_id(2)
    n_ht = pl.num_programs(2)

    TH, W, Cin = x_ref.shape[1], x_ref.shape[2], x_ref.shape[3]
    Cout = w_ref.shape[2] // 2

    # ---------------- pass 0: stream per-channel sum / sum-of-squares over H-tiles --------
    @pl.when(p == 0)
    def _stats():
        @pl.when(ht == 0)
        def _init():
            sum_ref[...] = jnp.zeros_like(sum_ref)
            ssq_ref[...] = jnp.zeros_like(ssq_ref)

        x = x_ref[0].astype(jnp.float32)                              # (TH, W, Cin)
        sum_ref[...] += jnp.sum(x, axis=(0, 1), keepdims=True)
        ssq_ref[...] += jnp.sum(x * x, axis=(0, 1), keepdims=True)

    # ---------------- pass 1: fused 3x3 convs + normalize + modulate + store ---------------
    @pl.when(p == 1)
    def _compute():
        # Rebuild only the 2 zero border COLUMNS each step (the halo rows + interior are
        # fully rewritten below).  This is cheap and stays correct no matter how the
        # parallel batch axis is sharded across TensorCores.
        zero_col = jnp.zeros((TH + 2, 1, Cin), jnp.float32)
        pad_ref[:, 0:1, :] = zero_col
        pad_ref[:, W + 1:W + 2, :] = zero_col

        top = idt_ref[0, 0].astype(jnp.float32)                       # (W, Cin)
        bot = idb_ref[0, 0].astype(jnp.float32)
        pad_ref[0, 1:W + 1, :] = jnp.where(ht == 0, jnp.zeros_like(top), top)
        pad_ref[TH + 1, 1:W + 1, :] = jnp.where(ht == n_ht - 1, jnp.zeros_like(bot), bot)
        pad_ref[1:TH + 1, 1:W + 1, :] = idc_ref[0].astype(jnp.float32)

        # Both 3x3 convs as 9 accumulated MXU matmuls with bf16 operands / f32 accumulation.
        # No 9x im2col slab is materialized; the padded tile is cast to bf16 once.
        padb = pad_ref[:, :W + 2, :].astype(jnp.bfloat16)              # (TH+2, W+2, Cin)
        acc = jnp.zeros((TH, W, 2 * Cout), jnp.float32)
        for kh in range(3):
            for kw in range(3):
                acc = acc + jax.lax.dot_general(
                    padb[kh:kh + TH, kw:kw + W, :],                    # (TH, W, Cin) bf16
                    w_ref[kh * 3 + kw],                                # (Cin, 2*Cout) bf16
                    dimension_numbers=(((2,), (0,)), ((), ())),
                    preferred_element_type=jnp.float32)
        conv = acc + b_ref[0]                                          # fused conv biases (f32)
        w_map = conv[..., :Cout]                                       # multiplicative map
        b_map = conv[..., Cout:]                                       # additive map

        # InstanceNorm2d from the pass-0 statistics (biased variance, eps inside rsqrt).
        mean = sum_ref[...] * inv_count                                # (1, 1, Cin)
        var = ssq_ref[...] * inv_count - mean * mean
        inv_std = jax.lax.rsqrt(var + EPS)                             # EUP

        x = x_ref[0].astype(jnp.float32)                               # (TH, W, Cin)
        x_norm = (x - mean) * inv_std

        o_ref[0] = (x_norm * w_map + b_map).astype(o_ref.dtype)


def spade_nhwc(x, identity_tensor, w_conv_k, w_conv_b, b_conv_k, b_conv_b,
               *, block_h=None, conv_dtype=jnp.bfloat16):
    """SPADE forward, NHWC at the op boundary.

    x               : (N, H, W, Cin) float32
    identity_tensor : (M, H, W, Cin) with M >= N; sliced to the first N samples
    w_conv_k/w_conv_b : "weight" Conv2d params, (Cout, Cin, 3, 3) / (Cout,)  (PyTorch OIHW)
    b_conv_k/b_conv_b : "bias"   Conv2d params, (Cout, Cin, 3, 3) / (Cout,)
    returns         : (N, H, W, Cout) float32
    """
    N, H, W, Cin = x.shape
    Cout = w_conv_k.shape[0]
    assert identity_tensor.shape[0] >= N

    if block_h is None:
        block_h = next((t for t in (128, 64, 32, 16, 8) if H % t == 0), H)
    TH = block_h
    assert H % TH == 0, "block_h must divide H"
    HT = H // TH

    # Conditioning tensor and fused conv weights carried in bf16 (MXU-native, half the DMA
    # bytes).  TODO(synk): in a real pipeline the producer should emit bf16 directly so this
    # cast does not cost an extra HBM pass.
    ident = identity_tensor[:N].astype(conv_dtype)

    # Fuse both conv branches into one (9, Cin, 2*Cout) tap tensor; tap order (kh, kw)
    # matches the in-kernel accumulation loop.
    def to_taps(k_oihw):
        return jnp.transpose(k_oihw, (2, 3, 1, 0)).reshape(9, Cin, Cout)

    w_taps = jnp.concatenate([to_taps(w_conv_k), to_taps(b_conv_k)], axis=-1).astype(conv_dtype)
    b_vec = jnp.concatenate([w_conv_b, b_conv_b]).reshape(1, 2 * Cout).astype(jnp.float32)

    Wp = ((W + 2 + 7) // 8) * 8          # sublane-aligned halo-scratch width
    kernel = functools.partial(spade_kernel, inv_count=1.0 / float(H * W))

    out = pl.pallas_call(
        kernel,
        out_shape=jax.ShapeDtypeStruct((N, H, W, Cout), jnp.float32),
        grid_spec=pltpu.PrefetchScalarGridSpec(
            num_scalar_prefetch=0,
            grid=(N, 2, HT),                       # batch, pass (stats / compute), H-tiles
            in_specs=[
                # x: needed by both passes.
                pl.BlockSpec((1, TH, W, Cin), lambda n, p, ht: (n, ht, 0, 0)),
                # identity tile: only needed in pass 1 (pinned to block 0 during pass 0).
                pl.BlockSpec((1, TH, W, Cin), lambda n, p, ht: (n, p * ht, 0, 0)),
                # 1-row halo above / below the tile (clamped at the sample edges; the kernel
                # zeroes them at ht == 0 / ht == HT-1 to realize the conv zero padding).
                pl.BlockSpec((1, 1, W, Cin),
                             lambda n, p, ht: (n, p * jnp.maximum(ht * TH - 1, 0), 0, 0)),
                pl.BlockSpec((1, 1, W, Cin),
                             lambda n, p, ht: (n, p * jnp.minimum((ht + 1) * TH, H - 1), 0, 0)),
                # fused conv weights / biases: small resident blocks.
                pl.BlockSpec((9, Cin, 2 * Cout), lambda n, p, ht: (0, 0, 0)),
                pl.BlockSpec((1, 2 * Cout), lambda n, p, ht: (0, 0)),
            ],
            # During pass 0 the output index is pinned to block (n, 0), so no garbage
            # write-backs happen; pass 1 writes each tile exactly once.
            out_specs=pl.BlockSpec((1, TH, W, Cout), lambda n, p, ht: (n, p * ht, 0, 0)),
            scratch_shapes=[
                pltpu.VMEM((TH + 2, Wp, Cin), jnp.float32),   # halo-padded identity tile
                pltpu.VMEM((1, 1, Cin), jnp.float32),         # running sum
                pltpu.VMEM((1, 1, Cin), jnp.float32),         # running sum of squares
            ],
        ),
        compiler_params=pltpu.CompilerParams(
            dimension_semantics=("parallel", "arbitrary", "arbitrary"),
            vmem_limit_bytes=_vmem_limit_bytes(),
        ),
    )(x, ident, ident, ident, w_taps, b_vec)
    return out


def reference_spade_nhwc(x, identity_tensor, w_conv_k, w_conv_b, b_conv_k, b_conv_b,
                         conv_dtype=None):
    """Pure-JAX NHWC reference mirroring the PyTorch module.

    If conv_dtype is given, the conv inputs (identity + kernels) are rounded to that dtype
    (matching the kernel's bf16-operand / f32-accumulate MXU path).
    """
    N = x.shape[0]
    ident = identity_tensor[:N]

    mean = x.mean(axis=(1, 2), keepdims=True)
    var = ((x - mean) ** 2).mean(axis=(1, 2), keepdims=True)
    x_norm = (x - mean) * jax.lax.rsqrt(var + EPS)

    w_k, b_k = w_conv_k, b_conv_k
    if conv_dtype is not None:
        ident = ident.astype(conv_dtype).astype(jnp.float32)
        w_k = w_k.astype(conv_dtype).astype(jnp.float32)
        b_k = b_k.astype(conv_dtype).astype(jnp.float32)

    def conv(inp, k_oihw, bias):
        k_hwio = jnp.transpose(k_oihw, (2, 3, 1, 0))
        out = jax.lax.conv_general_dilated(
            inp, k_hwio, window_strides=(1, 1), padding="SAME",
            dimension_numbers=("NHWC", "HWIO", "NHWC"),
            precision=jax.lax.Precision.HIGHEST)
        return out + bias.reshape(1, 1, 1, -1)

    w_map = conv(ident, w_k, w_conv_b)
    b_map = conv(ident, b_k, b_conv_b)
    return x_norm * w_map + b_map


if __name__ == "__main__":
    # Small shapes consistent with the module (in_C == out_C so torch.mul broadcasts).
    N, M, C, H, W = 2, 3, 4, 16, 16
    Cout = C

    key = jax.random.PRNGKey(0)
    kx, ki, k1, k2, k3, k4 = jax.random.split(key, 6)

    # PyTorch-natural NCHW tensors; converted ONCE to NHWC outside the op (in a real
    # pipeline the producer/consumer would supply NHWC directly — no transposes live
    # around the pallas_call itself).
    x_nchw = jax.random.normal(kx, (N, C, H, W), dtype=jnp.float32)
    id_nchw = jax.random.normal(ki, (M, C, H, W), dtype=jnp.float32)

    fan_in = C * 3 * 3
    bound = 1.0 / float(fan_in) ** 0.5
    w_conv_k = jax.random.uniform(k1, (Cout, C, 3, 3), jnp.float32, -bound, bound)
    w_conv_b = jax.random.uniform(k2, (Cout,), jnp.float32, -bound, bound)
    b_conv_k = jax.random.uniform(k3, (Cout, C, 3, 3), jnp.float32, -bound, bound)
    b_conv_b = jax.random.uniform(k4, (Cout,), jnp.float32, -bound, bound)

    x = jnp.transpose(x_nchw, (0, 2, 3, 1))        # (N, H, W, C)
    ident = jnp.transpose(id_nchw, (0, 2, 3, 1))   # (M, H, W, C)

    # block_h=8 -> 2 H-tiles per sample: exercises the streaming stats + halo machinery,
    # and makes the matmul M dim (TH*W = 128) a full MXU row block.
    out = jax.block_until_ready(
        spade_nhwc(x, ident, w_conv_k, w_conv_b, b_conv_k, b_conv_b, block_h=8))

    ref_bf16 = jax.block_until_ready(
        reference_spade_nhwc(x, ident, w_conv_k, w_conv_b, b_conv_k, b_conv_b,
                             conv_dtype=jnp.bfloat16))
    ref_f32 = jax.block_until_ready(
        reference_spade_nhwc(x, ident, w_conv_k, w_conv_b, b_conv_k, b_conv_b))

    assert out.shape == (N, H, W, Cout)
    # Tight check against a reference with the same bf16-operand / f32-accumulate conv.
    assert jnp.allclose(out, ref_bf16, rtol=1e-3, atol=1e-3), \
        "Pallas SPADE mismatch vs bf16-conv reference"
    # Loose check against the exact f32 module semantics (bf16 MXU inputs => few-1e-3 error).
    assert jnp.allclose(out, ref_f32, rtol=5e-2, atol=5e-2), \
        "Pallas SPADE mismatch vs f32 reference"

    print("KERNEL_OK")
</pallas_src>

<mosaic_0001>
module attributes {stable_mosaic.version = 11 : i64} {
  func.func @spade_kernel(%arg0: i32, %arg1: i32, %arg2: i32, %arg3: memref<1x8x16x4xf32, #tpu.memory_space<vmem>>, %arg4: memref<1x8x16x4xbf16, #tpu.memory_space<vmem>>, %arg5: memref<1x1x16x4xbf16, #tpu.memory_space<vmem>>, %arg6: memref<1x1x16x4xbf16, #tpu.memory_space<vmem>>, %arg7: memref<9x4x8xbf16, #tpu.memory_space<vmem>>, %arg8: memref<1x8xf32, #tpu.memory_space<vmem>>, %arg9: memref<1x8x16x4xf32, #tpu.memory_space<vmem>>, %arg10: memref<10x24x4xf32, #tpu.memory_space<vmem>>, %arg11: memref<1x1x4xf32, #tpu.memory_space<vmem>>, %arg12: memref<1x1x4xf32, #tpu.memory_space<vmem>>) attributes {dimension_semantics = [#tpu.dimension_semantics<parallel>, #tpu.dimension_semantics<arbitrary>, #tpu.dimension_semantics<arbitrary>], iteration_bounds = array<i64: 2, 2, 2>, scalar_prefetch = 0 : i64, scratch_operands = 3 : i64, tpu.core_type = #tpu.core_type<tc>, window_params = [{transform_indices = @transform_0, window_bounds = array<i64: 1, 8, 16, 4>}, {transform_indices = @transform_1, window_bounds = array<i64: 1, 8, 16, 4>}, {transform_indices = @transform_2, window_bounds = array<i64: 1, 1, 16, 4>}, {transform_indices = @transform_3, window_bounds = array<i64: 1, 1, 16, 4>}, {pipeline_mode = #tpu.pipeline_mode<synchronous>, transform_indices = @transform_4, window_bounds = array<i64: 9, 4, 8>}, {pipeline_mode = #tpu.pipeline_mode<synchronous>, transform_indices = @transform_5, window_bounds = array<i64: 1, 8>}, {transform_indices = @transform_6, window_bounds = array<i64: 1, 8, 16, 4>}]} {
    %c0_i32 = arith.constant 0 : i32
    %0 = arith.cmpi eq, %arg1, %c0_i32 : i32
    %1 = arith.extui %0 : i1 to i32
    %c0_i32_0 = arith.constant 0 : i32
    %2 = arith.cmpi ne, %1, %c0_i32_0 : i32
    scf.if %2 {
      %c0_i32_2 = arith.constant 0 : i32
      %6 = arith.cmpi eq, %arg2, %c0_i32_2 : i32
      %7 = arith.extui %6 : i1 to i32
      %c0_i32_3 = arith.constant 0 : i32
      %8 = arith.cmpi ne, %7, %c0_i32_3 : i32
      scf.if %8 {
        %cst_20 = arith.constant 0.000000e+00 : f32
        %22 = vector.broadcast %cst_20 : f32 to vector<1x1x4xf32>
        %c0_21 = arith.constant 0 : index
        %c0_22 = arith.constant 0 : index
        %c0_23 = arith.constant 0 : index
        %23 = vector.load %arg11[%c0_21, %c0_22, %c0_23] : memref<1x1x4xf32, #tpu.memory_space<vmem>>, vector<1x1x4xf32>
        tpu.vector_store %arg11[%c0_21, %c0_22, %c0_23], %22 {strides = array<i32>} : memref<1x1x4xf32, #tpu.memory_space<vmem>>, vector<1x1x4xf32>,
        %cst_24 = arith.constant 0.000000e+00 : f32
        %24 = vector.broadcast %cst_24 : f32 to vector<1x1x4xf32>
        %c0_25 = arith.constant 0 : index
        %c0_26 = arith.constant 0 : index
        %c0_27 = arith.constant 0 : index
        %25 = vector.load %arg12[%c0_25, %c0_26, %c0_27] : memref<1x1x4xf32, #tpu.memory_space<vmem>>, vector<1x1x4xf32>
        tpu.vector_store %arg12[%c0_25, %c0_26, %c0_27], %24 {strides = array<i32>} : memref<1x1x4xf32, #tpu.memory_space<vmem>>, vector<1x1x4xf32>,
      } else {
      }
      %c0 = arith.constant 0 : index
      %c0_4 = arith.constant 0 : index
      %c0_5 = arith.constant 0 : index
      %c0_6 = arith.constant 0 : index
      %9 = vector.load %arg3[%c0, %c0_4, %c0_5, %c0_6] : memref<1x8x16x4xf32, #tpu.memory_space<vmem>>, vector<1x8x16x4xf32>
      %10 = vector.shape_cast %9 : vector<1x8x16x4xf32> to vector<8x16x4xf32>
      %c0_7 = arith.constant 0 : index
      %c0_8 = arith.constant 0 : index
      %c0_9 = arith.constant 0 : index
      %11 = vector.load %arg11[%c0_7, %c0_8, %c0_9] : memref<1x1x4xf32, #tpu.memory_space<vmem>>, vector<1x1x4xf32>
      %cst = arith.constant dense<0.000000e+00> : vector<4xf32>
      %12 = vector.multi_reduction <add>, %10, %cst [0, 1] : vector<8x16x4xf32> to vector<4xf32>
      %13 = vector.shape_cast %12 : vector<4xf32> to vector<1x1x4xf32>
      %14 = arith.addf %11, %13 : vector<1x1x4xf32>
      %c0_10 = arith.constant 0 : index
      %c0_11 = arith.constant 0 : index
      %c0_12 = arith.constant 0 : index
      %15 = vector.load %arg11[%c0_10, %c0_11, %c0_12] : memref<1x1x4xf32, #tpu.memory_space<vmem>>, vector<1x1x4xf32>
      tpu.vector_store %arg11[%c0_10, %c0_11, %c0_12], %14 {strides = array<i32>} : memref<1x1x4xf32, #tpu.memory_space<vmem>>, vector<1x1x4xf32>,
      %c0_13 = arith.constant 0 : index
      %c0_14 = arith.constant 0 : index
      %c0_15 = arith.constant 0 : index
      %16 = vector.load %arg12[%c0_13, %c0_14, %c0_15] : memref<1x1x4xf32, #tpu.memory_space<vmem>>, vector<1x1x4xf32>
      %17 = arith.mulf %10, %10 : vector<8x16x4xf32>
      %cst_16 = arith.constant dense<0.000000e+00> : vector<4xf32>
      %18 = vector.multi_reduction <add>, %17, %cst_16 [0, 1] : vector<8x16x4xf32> to vector<4xf32>
      %19 = vector.shape_cast %18 : vector<4xf32> to vector<1x1x4xf32>
      %20 = arith.addf %16, %19 : vector<1x1x4xf32>
      %c0_17 = arith.constant 0 : index
      %c0_18 = arith.constant 0 : index
      %c0_19 = arith.constant 0 : index
      %21 = vector.load %arg12[%c0_17, %c0_18, %c0_19] : memref<1x1x4xf32, #tpu.memory_space<vmem>>, vector<1x1x4xf32>
      tpu.vector_store %arg12[%c0_17, %c0_18, %c0_19], %20 {strides = array<i32>} : memref<1x1x4xf32, #tpu.memory_space<vmem>>, vector<1x1x4xf32>,
    } else {
    }
    %c1_i32 = arith.constant 1 : i32
    %3 = arith.cmpi eq, %arg1, %c1_i32 : i32
    %4 = arith.extui %3 : i1 to i32
    %c0_i32_1 = arith.constant 0 : i32
    %5 = arith.cmpi ne, %4, %c0_i32_1 : i32
    scf.if %5 {
      %cst = arith.constant 0.000000e+00 : f32
      %6 = vector.broadcast %cst : f32 to vector<10x1x4xf32>
      %c0 = arith.constant 0 : index
      %c0_2 = arith.constant 0 : index
      %c0_3 = arith.constant 0 : index
      %7 = vector.load %arg10[%c0, %c0_2, %c0_3] : memref<10x24x4xf32, #tpu.memory_space<vmem>>, vector<10x1x4xf32>
      tpu.vector_store %arg10[%c0, %c0_2, %c0_3], %6 {strides = array<i32>} : memref<10x24x4xf32, #tpu.memory_space<vmem>>, vector<10x1x4xf32>,
      %c0_4 = arith.constant 0 : index
      %c17 = arith.constant 17 : index
      %c0_5 = arith.constant 0 : index
      %8 = vector.load %arg10[%c0_4, %c17, %c0_5] : memref<10x24x4xf32, #tpu.memory_space<vmem>>, vector<10x1x4xf32>
      tpu.vector_store %arg10[%c0_4, %c17, %c0_5], %6 {strides = array<i32>} : memref<10x24x4xf32, #tpu.memory_space<vmem>>, vector<10x1x4xf32>,
      %c0_6 = arith.constant 0 : index
      %c0_7 = arith.constant 0 : index
      %c0_8 = arith.constant 0 : index
      %c0_9 = arith.constant 0 : index
      %9 = vector.load %arg5[%c0_6, %c0_7, %c0_8, %c0_9] : memref<1x1x16x4xbf16, #tpu.memory_space<vmem>>, vector<1x1x16x4xbf16>
      %10 = vector.shape_cast %9 : vector<1x1x16x4xbf16> to vector<16x4xbf16>
      %11 = arith.extf %10 : vector<16x4xbf16> to vector<16x4xf32>
      %c0_10 = arith.constant 0 : index
      %c0_11 = arith.constant 0 : index
      %c0_12 = arith.constant 0 : index
      %c0_13 = arith.constant 0 : index
      %12 = vector.load %arg6[%c0_10, %c0_11, %c0_12, %c0_13] : memref<1x1x16x4xbf16, #tpu.memory_space<vmem>>, vector<1x1x16x4xbf16>
      %13 = vector.shape_cast %12 : vector<1x1x16x4xbf16> to vector<16x4xbf16>
      %14 = arith.extf %13 : vector<16x4xbf16> to vector<16x4xf32>
      %c0_i32_14 = arith.constant 0 : i32
      %15 = arith.cmpi eq, %arg2, %c0_i32_14 : i32
      %cst_15 = arith.constant 0.000000e+00 : f32
      %16 = vector.broadcast %cst_15 : f32 to vector<16x4xf32>
      %17 = arith.select %15, %16, %11 : vector<16x4xf32>
      %c0_16 = arith.constant 0 : index
      %c1 = arith.constant 1 : index
      %c0_17 = arith.constant 0 : index
      %18 = vector.load %arg10[%c0_16, %c1, %c0_17] : memref<10x24x4xf32, #tpu.memory_space<vmem>>, vector<1x16x4xf32>
      %19 = vector.shape_cast %18 : vector<1x16x4xf32> to vector<16x4xf32>
      %20 = vector.shape_cast %17 : vector<16x4xf32> to vector<1x16x4xf32>
      tpu.vector_store %arg10[%c0_16, %c1, %c0_17], %20 {strides = array<i32>} : memref<10x24x4xf32, #tpu.memory_space<vmem>>, vector<1x16x4xf32>,
      %c1_i32_18 = arith.constant 1 : i32
      %21 = arith.cmpi eq, %arg2, %c1_i32_18 : i32
      %cst_19 = arith.constant 0.000000e+00 : f32
      %22 = vector.broadcast %cst_19 : f32 to vector<16x4xf32>
      %23 = arith.select %21, %22, %14 : vector<16x4xf32>
      %c9 = arith.constant 9 : index
      %c1_20 = arith.constant 1 : index
      %c0_21 = arith.constant 0 : index
      %24 = vector.load %arg10[%c9, %c1_20, %c0_21] : memref<10x24x4xf32, #tpu.memory_space<vmem>>, vector<1x16x4xf32>
      %25 = vector.shape_cast %24 : vector<1x16x4xf32> to vector<16x4xf32>
      %26 = vector.shape_cast %23 : vector<16x4xf32> to vector<1x16x4xf32>
      tpu.vector_store %arg10[%c9, %c1_20, %c0_21], %26 {strides = array<i32>} : memref<10x24x4xf32, #tpu.memory_space<vmem>>, vector<1x16x4xf32>,
      %c0_22 = arith.constant 0 : index
      %c0_23 = arith.constant 0 : index
      %c0_24 = arith.constant 0 : index
      %c0_25 = arith.constant 0 : index
      %27 = vector.load %arg4[%c0_22, %c0_23, %c0_24, %c0_25] : memref<1x8x16x4xbf16, #tpu.memory_space<vmem>>, vector<1x8x16x4xbf16>
      %28 = vector.shape_cast %27 : vector<1x8x16x4xbf16> to vector<8x16x4xbf16>
      %29 = arith.extf %28 : vector<8x16x4xbf16> to vector<8x16x4xf32>
      %c1_26 = arith.constant 1 : index
      %c1_27 = arith.constant 1 : index
      %c0_28 = arith.constant 0 : index
      %30 = vector.load %arg10[%c1_26, %c1_27, %c0_28] : memref<10x24x4xf32, #tpu.memory_space<vmem>>, vector<8x16x4xf32>
      tpu.vector_store %arg10[%c1_26, %c1_27, %c0_28], %29 {strides = array<i32>} : memref<10x24x4xf32, #tpu.memory_space<vmem>>, vector<8x16x4xf32>,
      %c0_29 = arith.constant 0 : index
      %c0_30 = arith.constant 0 : index
      %c0_31 = arith.constant 0 : index
      %31 = vector.load %arg10[%c0_29, %c0_30, %c0_31] : memref<10x24x4xf32, #tpu.memory_space<vmem>>, vector<10x18x4xf32>
      %32 = arith.truncf %31 : vector<10x18x4xf32> to vector<10x18x4xbf16>
      %cst_32 = arith.constant 0.000000e+00 : f32
      %33 = vector.broadcast %cst_32 : f32 to vector<8x16x8xf32>
      %34 = vector.extract_strided_slice %32 {offsets = [0, 0, 0], sizes = [8, 16, 4], strides = [1, 1, 1]} : vector<10x18x4xbf16> to vector<8x16x4xbf16>
      %c0_33 = arith.constant 0 : index
      %c0_34 = arith.constant 0 : index
      %c0_35 = arith.constant 0 : index
      %35 = vector.load %arg7[%c0_33, %c0_34, %c0_35] : memref<9x4x8xbf16, #tpu.memory_space<vmem>>, vector<1x4x8xbf16>
      %36 = vector.shape_cast %35 : vector<1x4x8xbf16> to vector<4x8xbf16>
      %cst_36 = arith.constant dense<0.000000e+00> : vector<8x16x8xf32>
      %37 = tpu.matmul %34, %36, %cst_36 {dimension_numbers = #tpu.dot_dimension_numbers<[2], [0], [0, 1], [1], [0, 0, 0, 1, 1, 1], [], []>} : vector<8x16x4xbf16>, vector<4x8xbf16>, vector<8x16x8xf32> -> vector<8x16x8xf32>
      %38 = arith.addf %33, %37 : vector<8x16x8xf32>
      %39 = vector.extract_strided_slice %32 {offsets = [0, 1, 0], sizes = [8, 16, 4], strides = [1, 1, 1]} : vector<10x18x4xbf16> to vector<8x16x4xbf16>
      %c1_37 = arith.constant 1 : index
      %c0_38 = arith.constant 0 : index
      %c0_39 = arith.constant 0 : index
      %40 = vector.load %arg7[%c1_37, %c0_38, %c0_39] : memref<9x4x8xbf16, #tpu.memory_space<vmem>>, vector<1x4x8xbf16>
      %41 = vector.shape_cast %40 : vector<1x4x8xbf16> to vector<4x8xbf16>
      %cst_40 = arith.constant dense<0.000000e+00> : vector<8x16x8xf32>
      %42 = tpu.matmul %39, %41, %cst_40 {dimension_numbers = #tpu.dot_dimension_numbers<[2], [0], [0, 1], [1], [0, 0, 0, 1, 1, 1], [], []>} : vector<8x16x4xbf16>, vector<4x8xbf16>, vector<8x16x8xf32> -> vector<8x16x8xf32>
      %43 = arith.addf %38, %42 : vector<8x16x8xf32>
      %44 = vector.extract_strided_slice %32 {offsets = [0, 2, 0], sizes = [8, 16, 4], strides = [1, 1, 1]} : vector<10x18x4xbf16> to vector<8x16x4xbf16>
      %c2 = arith.constant 2 : index
      %c0_41 = arith.constant 0 : index
      %c0_42 = arith.constant 0 : index
      %45 = vector.load %arg7[%c2, %c0_41, %c0_42] : memref<9x4x8xbf16, #tpu.memory_space<vmem>>, vector<1x4x8xbf16>
      %46 = vector.shape_cast %45 : vector<1x4x8xbf16> to vector<4x8xbf16>
      %cst_43 = arith.constant dense<0.000000e+00> : vector<8x16x8xf32>
      %47 = tpu.matmul %44, %46, %cst_43 {dimension_numbers = #tpu.dot_dimension_numbers<[2], [0], [0, 1], [1], [0, 0, 0, 1, 1, 1], [], []>} : vector<8x16x4xbf16>, vector<4x8xbf16>, vector<8x16x8xf32> -> vector<8x16x8xf32>
      %48 = arith.addf %43, %47 : vector<8x16x8xf32>
      %49 = vector.extract_strided_slice %32 {offsets = [1, 0, 0], sizes = [8, 16, 4], strides = [1, 1, 1]} : vector<10x18x4xbf16> to vector<8x16x4xbf16>
      %c3 = arith.constant 3 : index
      %c0_44 = arith.constant 0 : index
      %c0_45 = arith.constant 0 : index
      %50 = vector.load %arg7[%c3, %c0_44, %c0_45] : memref<9x4x8xbf16, #tpu.memory_space<vmem>>, vector<1x4x8xbf16>
      %51 = vector.shape_cast %50 : vector<1x4x8xbf16> to vector<4x8xbf16>
      %cst_46 = arith.constant dense<0.000000e+00> : vector<8x16x8xf32>
      %52 = tpu.matmul %49, %51, %cst_46 {dimension_numbers = #tpu.dot_dimension_numbers<[2], [0], [0, 1], [1], [0, 0, 0, 1, 1, 1], [], []>} : vector<8x16x4xbf16>, vector<4x8xbf16>, vector<8x16x8xf32> -> vector<8x16x8xf32>
      %53 = arith.addf %48, %52 : vector<8x16x8xf32>
      %54 = vector.extract_strided_slice %32 {offsets = [1, 1, 0], sizes = [8, 16, 4], strides = [1, 1, 1]} : vector<10x18x4xbf16> to vector<8x16x4xbf16>
      %c4 = arith.constant 4 : index
      %c0_47 = arith.constant 0 : index
      %c0_48 = arith.constant 0 : index
      %55 = vector.load %arg7[%c4, %c0_47, %c0_48] : memref<9x4x8xbf16, #tpu.memory_space<vmem>>, vector<1x4x8xbf16>
      %56 = vector.shape_cast %55 : vector<1x4x8xbf16> to vector<4x8xbf16>
      %cst_49 = arith.constant dense<0.000000e+00> : vector<8x16x8xf32>
      %57 = tpu.matmul %54, %56, %cst_49 {dimension_numbers = #tpu.dot_dimension_numbers<[2], [0], [0, 1], [1], [0, 0, 0, 1, 1, 1], [], []>} : vector<8x16x4xbf16>, vector<4x8xbf16>, vector<8x16x8xf32> -> vector<8x16x8xf32>
      %58 = arith.addf %53, %57 : vector<8x16x8xf32>
      %59 = vector.extract_strided_slice %32 {offsets = [1, 2, 0], sizes = [8, 16, 4], strides = [1, 1, 1]} : vector<10x18x4xbf16> to vector<8x16x4xbf16>
      %c5 = arith.constant 5 : index
      %c0_50 = arith.constant 0 : index
      %c0_51 = arith.constant 0 : index
      %60 = vector.load %arg7[%c5, %c0_50, %c0_51] : memref<9x4x8xbf16, #tpu.memory_space<vmem>>, vector<1x4x8xbf16>
      %61 = vector.shape_cast %60 : vector<1x4x8xbf16> to vector<4x8xbf16>
      %cst_52 = arith.constant dense<0.000000e+00> : vector<8x16x8xf32>
      %62 = tpu.matmul %59, %61, %cst_52 {dimension_numbers = #tpu.dot_dimension_numbers<[2], [0], [0, 1], [1], [0, 0, 0, 1, 1, 1], [], []>} : vector<8x16x4xbf16>, vector<4x8xbf16>, vector<8x16x8xf32> -> vector<8x16x8xf32>
      %63 = arith.addf %58, %62 : vector<8x16x8xf32>
      %64 = vector.extract_strided_slice %32 {offsets = [2, 0, 0], sizes = [8, 16, 4], strides = [1, 1, 1]} : vector<10x18x4xbf16> to vector<8x16x4xbf16>
      %c6 = arith.constant 6 : index
      %c0_53 = arith.constant 0 : index
      %c0_54 = arith.constant 0 : index
      %65 = vector.load %arg7[%c6, %c0_53, %c0_54] : memref<9x4x8xbf16, #tpu.memory_space<vmem>>, vector<1x4x8xbf16>
      %66 = vector.shape_cast %65 : vector<1x4x8xbf16> to vector<4x8xbf16>
      %cst_55 = arith.constant dense<0.000000e+00> : vector<8x16x8xf32>
      %67 = tpu.matmul %64, %66, %cst_55 {dimension_numbers = #tpu.dot_dimension_numbers<[2], [0], [0, 1], [1], [0, 0, 0, 1, 1, 1], [], []>} : vector<8x16x4xbf16>, vector<4x8xbf16>, vector<8x16x8xf32> -> vector<8x16x8xf32>
      %68 = arith.addf %63, %67 : vector<8x16x8xf32>
      %69 = vector.extract_strided_slice %32 {offsets = [2, 1, 0], sizes = [8, 16, 4], strides = [1, 1, 1]} : vector<10x18x4xbf16> to vector<8x16x4xbf16>
      %c7 = arith.constant 7 : index
      %c0_56 = arith.constant 0 : index
      %c0_57 = arith.constant 0 : index
      %70 = vector.load %arg7[%c7, %c0_56, %c0_57] : memref<9x4x8xbf16, #tpu.memory_space<vmem>>, vector<1x4x8xbf16>
      %71 = vector.shape_cast %70 : vector<1x4x8xbf16> to vector<4x8xbf16>
      %cst_58 = arith.constant dense<0.000000e+00> : vector<8x16x8xf32>
      %72 = tpu.matmul %69, %71, %cst_58 {dimension_numbers = #tpu.dot_dimension_numbers<[2], [0], [0, 1], [1], [0, 0, 0, 1, 1, 1], [], []>} : vector<8x16x4xbf16>, vector<4x8xbf16>, vector<8x16x8xf32> -> vector<8x16x8xf32>
      %73 = arith.addf %68, %72 : vector<8x16x8xf32>
      %74 = vector.extract_strided_slice %32 {offsets = [2, 2, 0], sizes = [8, 16, 4], strides = [1, 1, 1]} : vector<10x18x4xbf16> to vector<8x16x4xbf16>
      %c8 = arith.constant 8 : index
      %c0_59 = arith.constant 0 : index
      %c0_60 = arith.constant 0 : index
      %75 = vector.load %arg7[%c8, %c0_59, %c0_60] : memref<9x4x8xbf16, #tpu.memory_space<vmem>>, vector<1x4x8xbf16>
      %76 = vector.shape_cast %75 : vector<1x4x8xbf16> to vector<4x8xbf16>
      %cst_61 = arith.constant dense<0.000000e+00> : vector<8x16x8xf32>
      %77 = tpu.matmul %74, %76, %cst_61 {dimension_numbers = #tpu.dot_dimension_numbers<[2], [0], [0, 1], [1], [0, 0, 0, 1, 1, 1], [], []>} : vector<8x16x4xbf16>, vector<4x8xbf16>, vector<8x16x8xf32> -> vector<8x16x8xf32>
      %78 = arith.addf %73, %77 : vector<8x16x8xf32>
      %c0_62 = arith.constant 0 : index
      %c0_63 = arith.constant 0 : index
      %79 = vector.load %arg8[%c0_62, %c0_63] : memref<1x8xf32, #tpu.memory_space<vmem>>, vector<1x8xf32>
      %80 = vector.shape_cast %79 : vector<1x8xf32> to vector<8xf32>
      %81 = vector.shape_cast %80 : vector<8xf32> to vector<1x1x8xf32>
      %82 = vector.broadcast %81 : vector<1x1x8xf32> to vector<8x16x8xf32>
      %83 = arith.addf %78, %82 : vector<8x16x8xf32>
      %84 = vector.extract_strided_slice %83 {offsets = [0, 0, 0], sizes = [8, 16, 4], strides = [1, 1, 1]} : vector<8x16x8xf32> to vector<8x16x4xf32>
      %85 = vector.extract_strided_slice %83 {offsets = [0, 0, 4], sizes = [8, 16, 4], strides = [1, 1, 1]} : vector<8x16x8xf32> to vector<8x16x4xf32>
      %c0_64 = arith.constant 0 : index
      %c0_65 = arith.constant 0 : index
      %c0_66 = arith.constant 0 : index
      %86 = vector.load %arg11[%c0_64, %c0_65, %c0_66] : memref<1x1x4xf32, #tpu.memory_space<vmem>>, vector<1x1x4xf32>
      %cst_67 = arith.constant 3.906250e-03 : f32
      %87 = vector.broadcast %cst_67 : f32 to vector<1x1x4xf32>
      %88 = arith.mulf %86, %87 : vector<1x1x4xf32>
      %c0_68 = arith.constant 0 : index
      %c0_69 = arith.constant 0 : index
      %c0_70 = arith.constant 0 : index
      %89 = vector.load %arg12[%c0_68, %c0_69, %c0_70] : memref<1x1x4xf32, #tpu.memory_space<vmem>>, vector<1x1x4xf32>
      %cst_71 = arith.constant 3.906250e-03 : f32
      %90 = vector.broadcast %cst_71 : f32 to vector<1x1x4xf32>
      %91 = arith.mulf %89, %90 : vector<1x1x4xf32>
      %92 = arith.mulf %88, %88 : vector<1x1x4xf32>
      %93 = arith.subf %91, %92 : vector<1x1x4xf32>
      %cst_72 = arith.constant 9.99999974E-6 : f32
      %94 = vector.broadcast %cst_72 : f32 to vector<1x1x4xf32>
      %95 = arith.addf %93, %94 : vector<1x1x4xf32>
      %96 = math.rsqrt %95 : vector<1x1x4xf32>
      %c0_73 = arith.constant 0 : index
      %c0_74 = arith.constant 0 : index
      %c0_75 = arith.constant 0 : index
      %c0_76 = arith.constant 0 : index
      %97 = vector.load %arg3[%c0_73, %c0_74, %c0_75, %c0_76] : memref<1x8x16x4xf32, #tpu.memory_space<vmem>>, vector<1x8x16x4xf32>
      %98 = vector.shape_cast %97 : vector<1x8x16x4xf32> to vector<8x16x4xf32>
      %99 = vector.broadcast %88 : vector<1x1x4xf32> to vector<8x16x4xf32>
      %100 = arith.subf %98, %99 : vector<8x16x4xf32>
      %101 = vector.broadcast %96 : vector<1x1x4xf32> to vector<8x16x4xf32>
      %102 = arith.mulf %100, %101 : vector<8x16x4xf32>
      %103 = arith.mulf %102, %84 : vector<8x16x4xf32>
      %104 = arith.addf %103, %85 : vector<8x16x4xf32>
      %c0_77 = arith.constant 0 : index
      %c0_78 = arith.constant 0 : index
      %c0_79 = arith.constant 0 : index
      %c0_80 = arith.constant 0 : index
      %105 = vector.load %arg9[%c0_77, %c0_78, %c0_79, %c0_80] : memref<1x8x16x4xf32, #tpu.memory_space<vmem>>, vector<1x8x16x4xf32>
      %106 = vector.shape_cast %105 : vector<1x8x16x4xf32> to vector<8x16x4xf32>
      %107 = vector.shape_cast %104 : vector<8x16x4xf32> to vector<1x8x16x4xf32>
      tpu.vector_store %arg9[%c0_77, %c0_78, %c0_79, %c0_80], %107 {strides = array<i32>} : memref<1x8x16x4xf32, #tpu.memory_space<vmem>>, vector<1x8x16x4xf32>,
    } else {
    }
    return
  }
  func.func @transform_0(%arg0: i32, %arg1: i32, %arg2: i32) -> (i32, i32, i32, i32) {
    %c0_i32 = arith.constant 0 : i32
    %c0_i32_0 = arith.constant 0 : i32
    %c0_i32_1 = arith.constant 0 : i32
    return %arg0, %arg2, %c0_i32, %c0_i32_0 : i32, i32, i32, i32
  }
  func.func @transform_1(%arg0: i32, %arg1: i32, %arg2: i32) -> (i32, i32, i32, i32) {
    %0 = arith.muli %arg1, %arg2 : i32
    %c0_i32 = arith.constant 0 : i32
    %c0_i32_0 = arith.constant 0 : i32
    %c0_i32_1 = arith.constant 0 : i32
    return %arg0, %0, %c0_i32, %c0_i32_0 : i32, i32, i32, i32
  }
  func.func @transform_2(%arg0: i32, %arg1: i32, %arg2: i32) -> (i32, i32, i32, i32) {
    %c8_i32 = arith.constant 8 : i32
    %0 = arith.muli %arg2, %c8_i32 : i32
    %c1_i32 = arith.constant 1 : i32
    %1 = arith.subi %0, %c1_i32 : i32
    %c0_i32 = arith.constant 0 : i32
    %2 = arith.maxsi %1, %c0_i32 : i32
    %3 = arith.muli %arg1, %2 : i32
    %c0_i32_0 = arith.constant 0 : i32
    %c0_i32_1 = arith.constant 0 : i32
    %c0_i32_2 = arith.constant 0 : i32
    return %arg0, %3, %c0_i32_0, %c0_i32_1 : i32, i32, i32, i32
  }
  func.func @transform_3(%arg0: i32, %arg1: i32, %arg2: i32) -> (i32, i32, i32, i32) {
    %c1_i32 = arith.constant 1 : i32
    %0 = arith.addi %arg2, %c1_i32 : i32
    %c8_i32 = arith.constant 8 : i32
    %1 = arith.muli %0, %c8_i32 : i32
    %c15_i32 = arith.constant 15 : i32
    %2 = arith.minsi %1, %c15_i32 : i32
    %3 = arith.muli %arg1, %2 : i32
    %c0_i32 = arith.constant 0 : i32
    %c0_i32_0 = arith.constant 0 : i32
    %c0_i32_1 = arith.constant 0 : i32
    return %arg0, %3, %c0_i32, %c0_i32_0 : i32, i32, i32, i32
  }
  func.func @transform_4(%arg0: i32, %arg1: i32, %arg2: i32) -> (i32, i32, i32) {
    %c0_i32 = arith.constant 0 : i32
    %c0_i32_0 = arith.constant 0 : i32
    %c0_i32_1 = arith.constant 0 : i32
    %c0_i32_2 = arith.constant 0 : i32
    return %c0_i32, %c0_i32_0, %c0_i32_1 : i32, i32, i32
  }
  func.func @transform_5(%arg0: i32, %arg1: i32, %arg2: i32) -> (i32, i32) {
    %c0_i32 = arith.constant 0 : i32
    %c0_i32_0 = arith.constant 0 : i32
    %c0_i32_1 = arith.constant 0 : i32
    return %c0_i32, %c0_i32_0 : i32, i32
  }
  func.func @transform_6(%arg0: i32, %arg1: i32, %arg2: i32) -> (i32, i32, i32, i32) {
    %0 = arith.muli %arg1, %arg2 : i32
    %c0_i32 = arith.constant 0 : i32
    %c0_i32_0 = arith.constant 0 : i32
    %c0_i32_1 = arith.constant 0 : i32
    return %arg0, %0, %c0_i32, %c0_i32_0 : i32, i32, i32, i32
  }
}

</mosaic_0001>

<bundles_post_ra>
// kernel: tpu_custom_call.1
= control target key start
LH: loop header
LB: loop body
LE: loop exit
PB: predicated region body
PF: predicated region fallthrough
CT: control target
= control target key end

     0   :  { %s3133_s21 = smov 0   ;;  %s3135_s22 = smov 0   ;;  %s3849_s0 = inlined_call_operand.vmem [shape: f32[2,16,16,4], index: 0, kind: input, shape index: {}]   ;;  %s3850_s1 = inlined_call_operand.vmem [shape: bf16[2,16,16,4], index: 1, kind: input, shape index: {}]   ;;  %s3851_s2 = inlined_call_operand.vmem [shape: bf16[2,16,16,4], index: 2, kind: input, shape index: {}]   ;;  %s3852_s3 = inlined_call_operand.vmem [shape: bf16[2,16,16,4], index: 3, kind: input, shape index: {}]   ;;  %s3853_s4 = inlined_call_operand.vmem [shape: bf16[9,4,8], index: 4, kind: input, shape index: {}]   ;;  %s3854_s5 = inlined_call_operand.vmem [shape: f32[1,8], index: 5, kind: input, shape index: {}]   ;;  %s3855_s6 = inlined_call_operand.vmem [shape: f32[2,16,16,4], index: 6, kind: output, shape index: {}]  }
   0x1   :  { %3857 = sst [smem:[#allocation9_spill]] %s3849_s0  ;;  %s3137_s23 = smov 0  }
   0x2   :  { %3858 = sst [smem:[#allocation10_spill]] %s3850_s1  ;;  %s3139_s24 = smov 0  }
   0x3   :  { %s3141_s25 = smov 0   ;;  %s3143_s26 = smov 0  }
   0x4   :  { %s3145_s27 = smov 0  }
   0x5 LB: > { %3859 = sst [smem:[#allocation5_spill]] %s3089_s26  ;;  %s28_s28 = sadd.s32 1, %s3081_s24  ;;  %s3093_s27 = sphi %s3145_s27, %s16_s27   ;;  %s3089_s26 = sphi %s3143_s26, %s3868_s26   ;;  %s3085_s25 = sphi %s3141_s25, %s3872_s25   ;;  %s3081_s24 = sphi %s3139_s24, %s3871_s24   ;;  %s3077_s23 = sphi %s3137_s23, %s3865_s23   ;;  %s3073_s22 = sphi %s3135_s22, %s3870_s22   ;;  %s3069_s21 = sphi %s3133_s21, %s3869_s21  }
   0x6   : > { %p29_p0 = scmp.ge.s32.totalorder %s28_s28, 2  ;;  %s31_s29 = sadd.s32 1, %s3085_s25 }
   0x7   : > { %p2434_p1 = scmp.ge.s32.totalorder %s3093_s27, 1  ;;  %p337_p2 = scmp.lt.s32.totalorder %s3093_s27, 9 }
   0x8   : > { %s3874_s28 = smov (%p29_p0, %s28_s28), 0  ;;  %s3876_s29 = smov (!%p29_p0, %s31_s29), %s3085_s25 }
   0x9   : > { %3860 = sst [smem:[#allocation6_spill]] %s3874_s28  ;;  %p338_p3 = pnand %p2434_p1, %p337_p2 }
   0xa   : > { %p33_p4 = scmp.ge.s32.totalorder %s3876_s29, 2  ;;  %s35_s30 = sadd.s32 1, %s3089_s26 }
   0xb   : > { %341 = sbr.rel (%p338_p3) target bundleno = 610 (0x262), region = 44  ;;  %s2435_s7 = sshll.u32 (!%p338_p3), %s3069_s21, 3 }
   0xc   : > { %s3878_s29 = smov (%p33_p4, %s3876_s29), 0  ;;  %s3880_s30 = smov (!%p33_p4, %s35_s30), %s3089_s26 }
   0xd   : > { %3861 = sst [smem:[#allocation7_spill]] %s3878_s29  ;;  %p37_p5 = scmp.ge.s32.totalorder %s3880_s30, 2 }
   0xe   : > { %p418_p6 = scmp.lt.s32.totalorder (!%p338_p3), %s3077_s23, 1  ;;  %p420_p7 = scmp.lt.s32.totalorder (!%p338_p3), %s2435_s7, 15 }
   0xf   : > { %s3882_s30 = smov (%p37_p5, %s3880_s30), 0  ;;  %s428_s8 = smul.u32 (!%p338_p3), %s3069_s21, %s3073_s22 }
  0x10   : > { %3862 = sst [smem:[#allocation8_spill]] %s3882_s30  ;;  %s2444_s14 = sadd.s32 (!%p338_p3), 4294967295, %s2435_s7 }
  0x11   : > { %s2439_s11 = sshll.u32 (!%p338_p3), %s428_s8, 3  ;;  %p443_p9 = scmp.gt.s32.totalorder (!%p338_p3), %s2444_s14, 0 }
  0x12   : > { %s3884_s23 = smov (!%p418_p6, %s3077_s23), 1  ;;  %p432_p8 = scmp.lt.s32.totalorder %s2439_s11, 15 }
  0x13   : > { %s421_s9 = scalar_select %p420_p7, %s2435_s7, 15 }
  0x14   : > { %s3182_s10 = sshll.u32 %s3884_s23, 5  ;;  %s3863_s0 = sld [smem:[#allocation9_spill]] }
  0x15   : > { %s2436_s12 = sshll.u32 %s421_s9, 1  ;;  %s2547_s19 = sadd.s32 8, %s2435_s7 }
  0x16   : > { %s424_s13 = sadd.s32 %s3182_s10, %s2436_s12  ;;  %s3886_s11 = smov (!%p432_p8, %s2439_s11), 15 }
  0x17   : > { %s2438_s15 = sshll.u32 %s424_s13, 3  ;;  %s3888_s14 = smov (!%p443_p9, %s2444_s14), 0 }
  0x18   : > { %s2440_s20 = sshll.u32 %s3886_s11, 1  ;;  %p462_p10 = scmp.lt.s32.totalorder %s2547_s19, 15 }
  0x19   : > { %s436_s23 = sadd.s32 %s2440_s20, %s3182_s10  ;;  %s445_s8 = smul.u32 %s3073_s22, %s3888_s14 }
  0x1a   : > { %s3188_s18 = scalar_lea.vmem %s3863_s0, %s2438_s15  ;;  %s2442_s9 = sshll.u32 %s436_s23, 2 }
  0x1b   : > { %s2455_s12 = sshll.u32 %s436_s23, 3  ;;  %s3864_s1 = sld [smem:[#allocation10_spill]] }
  0x1c   : > { %p448_p11 = scmp.lt.s32.totalorder %s445_s8, 15  ;;  %s3890_s19 = smov (!%p462_p10, %s2547_s19), 15 }
  0x1d   : > { %s464_s15 = smul.u32 %s3073_s22, %s3890_s19  ;;  %s3201_s17 = scalar_lea.vmem %s3855_s6, %s2455_s12 }
  0x1e   : > { %s3892_s8 = smov (!%p448_p11, %s445_s8), 15  ;;  %p2456_p13 = scmp.ne.s32.totalorder %s3073_s22, 0 }
  0x1f   : > { %s2445_s11 = sshll.u32 %s3892_s8, 1  ;;  %p467_p12 = scmp.lt.s32.totalorder %s464_s15, 15 }
  0x20   : > { %s452_s20 = sadd.s32 %s2445_s11, %s3182_s10  ;;  %496 = sbr.rel (%p2456_p13) target bundleno = 96 (0x60), region = 48 }
  0x21   : > { %s3195_s29 = scalar_lea.vmem %s3864_s1, %s2442_s9  ;;  %s2447_s14 = sshll.u32 %s452_s20, 2 }
  0x22   : > { %s3207_s28 = scalar_lea.vmem %s3851_s2, %s2447_s14  ;;  %s3894_s15 = smov (!%p467_p12, %s464_s15), 15 }
  0x23   : > { %s2449_s30 = sshll.u32 %s3894_s15, 1  ;;  %p2457_p0 = scmp.ne.s32.totalorder (!%p2456_p13), %s3069_s21, 0 }
  0x24   : > { %s471_s9 = sadd.s32 %s2449_s30, %s3182_s10 }
  0x25   : > { %s2451_s13 = sshll.u32 %s471_s9, 2 }
  0x26   : > { %s3213_s26 = scalar_lea.vmem %s3852_s3, %s2451_s13 }
  0x27   : > { %500 = sbr.rel (%p2457_p0) target bundleno = 46 (0x2e), region = 52  ;;  %vm501_vm0 = vcmask (!%p2457_p0), 24576   ;;  %v3095_v0 = vmov (!%p2457_p0), 0.0  }
  0x28   : > { %502 = vst.msk [vmem:[#allocation3] sm:$0x1] (!%p2457_p0), %vm501_vm0, %v3095_v0  ;;  %503 = vst.msk [vmem:[#allocation4] sm:$0x1] (!%p2457_p0), %vm501_vm0, %v3095_v0 }
  0x2e PF: > { %v504_v1 = vld [vmem:[%s3188_s18] sm:$0xff]  ;;  %v505_v2 = vld [vmem:[%s3188_s18 + $0x8] sm:$0xff]  ;;  %v506_v3 = vld [vmem:[%s3188_s18 + $0x10] sm:$0xff]  ;;  %vm521_vm1 = vcmask 31744   ;;  %vm560_vm2 = vcmask 24576  }
  0x2f   : > { %v522_v4 = vsel %vm521_vm1, %v504_v1, 0.0  ;;  %v523_v5 = vsel %vm521_vm1, %v505_v2, 0.0  ;;  %v525_v6 = vsel %vm521_vm1, %v506_v3, 0.0  ;;  %v507_v7 = vld [vmem:[%s3188_s18 + $0x18] sm:$0xff]  ;;  %v508_v10 = vld [vmem:[%s3188_s18 + $0x20] sm:$0xff]  ;;  %v509_v13 = vld [vmem:[%s3188_s18 + $0x28] sm:$0xff]  ;;  %v563_v15 = vmul.f32 %v504_v1, %v504_v1 }
  0x30   : > { %v524_v8 = vadd.f32 %v523_v5, %v522_v4  ;;  %v527_v9 = vsel %vm521_vm1, %v507_v7, 0.0  ;;  %v529_v12 = vsel %vm521_vm1, %v508_v10, 0.0  ;;  %v564_v16 = vmul.f32 %v505_v2, %v505_v2  ;;  %v510_v19 = vld [vmem:[%s3188_s18 + $0x30] sm:$0xff]  ;;  %v511_v24 = vld [vmem:[%s3188_s18 + $0x38] sm:$0xff]  ;;  %v512_v31 = vld [vmem:[%s3188_s18 + $0x40] sm:$0xff] }
  0x31   : > { %v565_v17 = vmul.f32 %v506_v3, %v506_v3  ;;  %v531_v18 = vsel %vm521_vm1, %v509_v13, 0.0  ;;  %v566_v21 = vmul.f32 %v507_v7, %v507_v7  ;;  %v533_v22 = vsel %vm521_vm1, %v510_v19, 0.0  ;;  %v513_v37 = vld [vmem:[%s3188_s18 + $0x48] sm:$0xff]  ;;  %v514_v43 = vld [vmem:[%s3188_s18 + $0x50] sm:$0xff]  ;;  %v515_v49 = vld [vmem:[%s3188_s18 + $0x58] sm:$0xff] }
  0x32   : > { %v526_v11 = vadd.f32 %v525_v6, %v524_v8  ;;  %v567_v23 = vmul.f32 %v508_v10, %v508_v10  ;;  %v579_v26 = vsel %vm521_vm1, %v563_v15, 0.0  ;;  %v580_v27 = vsel %vm521_vm1, %v564_v16, 0.0  ;;  %v516_v55 = vld [vmem:[%s3188_s18 + $0x60] sm:$0xff]  ;;  %v517_v61 = vld [vmem:[%s3188_s18 + $0x68] sm:$0xff]  ;;  %v518_v3 = vld [vmem:[%s3188_s18 + $0x70] sm:$0xff] }
  0x33   : > { %v582_v28 = vsel %vm521_vm1, %v565_v17, 0.0  ;;  %v535_v29 = vsel %vm521_vm1, %v511_v24, 0.0  ;;  %v581_v30 = vadd.f32 %v580_v27, %v579_v26  ;;  %v568_v33 = vmul.f32 %v509_v13, %v509_v13 }
  0x34   : > { %v528_v14 = vadd.f32 %v527_v9, %v526_v11  ;;  %v584_v34 = vsel %vm521_vm1, %v566_v21, 0.0  ;;  %v537_v35 = vsel %vm521_vm1, %v512_v31, 0.0  ;;  %v569_v39 = vmul.f32 %v510_v19, %v510_v19  ;;  %v519_v9 = vld [vmem:[%s3188_s18 + $0x78] sm:$0xff] }
  0x35   : > { %v583_v36 = vadd.f32 %v582_v28, %v581_v30  ;;  %v586_v40 = vsel %vm521_vm1, %v567_v23, 0.0  ;;  %v539_v41 = vsel %vm521_vm1, %v513_v37, 0.0  ;;  %v570_v45 = vmul.f32 %v511_v24, %v511_v24 }
  0x36   : > { %v530_v20 = vadd.f32 %v529_v12, %v528_v14  ;;  %v588_v46 = vsel %vm521_vm1, %v568_v33, 0.0  ;;  %v541_v47 = vsel %vm521_vm1, %v514_v43, 0.0  ;;  %v571_v51 = vmul.f32 %v512_v31, %v512_v31 }
  0x37   : > { %v585_v42 = vadd.f32 %v584_v34, %v583_v36  ;;  %v590_v52 = vsel %vm521_vm1, %v569_v39, 0.0  ;;  %v543_v53 = vsel %vm521_vm1, %v515_v49, 0.0  ;;  %v572_v57 = vmul.f32 %v513_v37, %v513_v37  ;;  %v520_v36 = vld [vmem:[#allocation3] sm:$0x1] }
  0x38   : > { %v532_v25 = vadd.f32 %v531_v18, %v530_v20  ;;  %v592_v58 = vsel %vm521_vm1, %v570_v45, 0.0  ;;  %v545_v59 = vsel %vm521_vm1, %v516_v55, 0.0  ;;  %v573_v63 = vmul.f32 %v514_v43, %v514_v43 }
  0x39   : > { %v587_v48 = vadd.f32 %v586_v40, %v585_v42  ;;  %v594_v0 = vsel %vm521_vm1, %v571_v51, 0.0  ;;  %v547_v1 = vsel %vm521_vm1, %v517_v61, 0.0  ;;  %v574_v5 = vmul.f32 %v515_v49, %v515_v49 }
  0x3a   : > { %v534_v32 = vadd.f32 %v533_v22, %v532_v25  ;;  %v596_v6 = vsel %vm521_vm1, %v572_v57, 0.0  ;;  %v549_v7 = vsel %vm521_vm1, %v518_v3, 0.0  ;;  %v575_v11 = vmul.f32 %v516_v55, %v516_v55 }
  0x3b   : > { %v589_v54 = vadd.f32 %v588_v46, %v587_v48  ;;  %v598_v12 = vsel %vm521_vm1, %v573_v63, 0.0  ;;  %v551_v13 = vsel %vm521_vm1, %v519_v9, 0.0  ;;  %v576_v16 = vmul.f32 %v517_v61, %v517_v61 }
  0x3c   : > { %v536_v38 = vadd.f32 %v535_v29, %v534_v32  ;;  %v600_v17 = vsel %vm521_vm1, %v574_v5, 0.0  ;;  %v577_v20 = vmul.f32 %v518_v3, %v518_v3  ;;  %v602_v21 = vsel %vm521_vm1, %v575_v11, 0.0 }
  0x3d   : > { %v591_v60 = vadd.f32 %v590_v52, %v589_v54  ;;  %v578_v24 = vmul.f32 %v519_v9, %v519_v9  ;;  %v604_v25 = vsel %vm521_vm1, %v576_v16, 0.0 }
  0x3e   : > { %v538_v44 = vadd.f32 %v537_v35, %v536_v38  ;;  %v606_v28 = vsel %vm521_vm1, %v577_v20, 0.0 }
  0x3f   : > { %v593_v2 = vadd.f32 %v592_v58, %v591_v60  ;;  %v608_v31 = vsel %vm521_vm1, %v578_v24, 0.0 }
  0x40   : > { %v540_v50 = vadd.f32 %v539_v41, %v538_v44  ;;  %v562_v44 = vld [vmem:[#allocation4] sm:$0x1] }
  0x41   : > { %v595_v8 = vadd.f32 %v594_v0, %v593_v2 }
  0x42   : > { %v542_v56 = vadd.f32 %v541_v47, %v540_v50 }
  0x43   : > { %v597_v14 = vadd.f32 %v596_v6, %v595_v8 }
  0x44   : > { %v544_v62 = vadd.f32 %v543_v53, %v542_v56 }
  0x45   : > { %v599_v18 = vadd.f32 %v598_v12, %v597_v14 }
  0x46   : > { %v546_v4 = vadd.f32 %v545_v59, %v544_v62 }
  0x47   : > { %v601_v22 = vadd.f32 %v600_v17, %v599_v18 }
  0x48   : > { %v548_v10 = vadd.f32 %v547_v1, %v546_v4 }
  0x49   : > { %v603_v26 = vadd.f32 %v602_v21, %v601_v22 }
  0x4a   : > { %v550_v15 = vadd.f32 %v549_v7, %v548_v10 }
  0x4b   : > { %v605_v29 = vadd.f32 %v604_v25, %v603_v26 }
  0x4c   : > { %v552_v19 = vadd.f32 %v551_v13, %v550_v15 }
  0x4d   : > { %v607_v32 = vadd.f32 %v606_v28, %v605_v29 }
  0x4e   : > { %v553_v23 = vrot.slane %v552_v19, 4 }
  0x4f   : > { %v609_v34 = vadd.f32 %v608_v31, %v607_v32 }
  0x50   : > { %v554_v27 = vadd.f32 %v553_v23, %v552_v19 }
  0x51   : > { %v610_v37 = vrot.slane %v609_v34, 4 }
  0x52   : > { %v555_v30 = vrot.slane %v554_v27, 2 }
  0x53   : > { %v611_v39 = vadd.f32 %v610_v37, %v609_v34 }
  0x54   : > { %v556_v33 = vadd.f32 %v555_v30, %v554_v27 }
  0x55   : > { %v612_v41 = vrot.slane %v611_v39, 2 }
  0x56   : > { %v557_v35 = vrot.slane %v556_v33, 1 }
  0x57   : > { %v613_v42 = vadd.f32 %v612_v41, %v611_v39 }
  0x58   : > { %v558_v38 = vadd.f32 %v557_v35, %v556_v33 }
  0x59   : > { %v614_v43 = vrot.slane %v613_v42, 1 }
  0x5a   : > { %v559_v40 = vadd.f32 %v558_v38, %v520_v36 }
  0x5b   : > { %v615_v45 = vadd.f32 %v614_v43, %v613_v42 }
  0x5c   : > { %561 = vst.msk [vmem:[#allocation3] sm:$0x1] %vm560_vm2, %v559_v40 }
  0x5d   : > { %v616_v46 = vadd.f32 %v615_v45, %v562_v44 }
  0x5f   : > { %617 = vst.msk [vmem:[#allocation4] sm:$0x1] %vm560_vm2, %v616_v46 }
  0x60 PF: > { %p2458_p1 = scmp.ne.s32.totalorder %s3073_s22, 1 }
  0x61   : > { %vm892_vm3 = vcmask (!%p2458_p1), 1041408   ;;  %v3269_v47 = vld [vmem:[%s3853_s4 + $0x8] sm:$0x3] (!%p2458_p1)  ;;  %v2459_v48 = vld [vmem:[%s3853_s4 + $0x2] sm:$0x3] (!%p2458_p1)  ;;  %vm622_vm4 = vcmask (!%p2458_p1), 24576  }
  0x62   : > { %621 = sbr.rel (%p2458_p1) target bundleno = 610 (0x262), region = 56  ;;  %2972 = vmatprep.subr.msk.bf16.mxu0 (!%p2458_p1), %vm892_vm3, %v3269_v47  ;;  %v3278_v49 = vsel (!%p2458_p1), %vm892_vm3, %v3269_v47, 0  ;;  %2968 = vmatprep.subr.msk.bf16.mxu1 (!%p2458_p1), %vm892_vm3, %v2459_v48  ;;  %vm657_vm5 = vcmask (!%p2458_p1), 31744   ;;  %v2557_v50 = vld [vmem:[%s3195_s29] sm:$0xff] (!%p2458_p1)   ;;  %v3096_v51 = vmov (!%p2458_p1), 0.0   ;;  %v894_v54 = vsel (!%p2458_p1), %vm892_vm3, %v2459_v48, 0 }
  0x63   : > { %2749 = vmatpush3.bf16.msra.mxu0 (!%p2458_p1), %v3278_v49  ;;  %624 = vst.msk [vmem:[#allocation2 + $0x18] sm:$0x1] (!%p2458_p1), %vm622_vm4, %v3096_v51  ;;  %634 = vst.msk [vmem:[#allocation2 + $0x29] sm:$0x1] (!%p2458_p1), %vm622_vm4, %v3096_v51  ;;  %v2558_v52 = vunpack.c.l.bf16 (!%p2458_p1), %v2557_v50  ;;  %v2559_v53 = vunpack.c.h.bf16 (!%p2458_p1), %v2557_v50  ;;  %v2588_v55 = vld [vmem:[%s3195_s29 + $0x8] sm:$0xff] (!%p2458_p1)   ;;  %v2549_v56 = vld [vmem:[%s3207_s28] sm:$0xff] (!%p2458_p1)   ;;  %2677 = vmatpush3.bf16.msra.mxu1 (!%p2458_p1), %v894_v54 }
  0x64   : > { %623 = vst.msk [vmem:[#allocation2] sm:$0x1] (!%p2458_p1), %vm622_vm4, %v3096_v51  ;;  %625 = vst.msk [vmem:[#allocation2 + $0x30] sm:$0x1] (!%p2458_p1), %vm622_vm4, %v3096_v51  ;;  %p651_p2 = scmp.eq.s32.totalorder (!%p2458_p1), %s3069_s21, 0  ;;  %v2562_v58 = vunpack.c.l.bf16 (!%p2458_p1), %v2588_v55  ;;  %v2563_v59 = vunpack.c.h.bf16 (!%p2458_p1), %v2588_v55  ;;  %v2589_v61 = vld [vmem:[%s3195_s29 + $0x10] sm:$0xff] (!%p2458_p1)   ;;  %v2550_v63 = vunpack.c.l.bf16 (!%p2458_p1), %v2549_v56  ;;  %v2551_v0 = vunpack.c.h.bf16 (!%p2458_p1), %v2549_v56 }
  0x65   : > { %626 = vst.msk [vmem:[#allocation2 + $0x48] sm:$0x1] (!%p2458_p1), %vm622_vm4, %v3096_v51  ;;  %627 = vst.msk [vmem:[#allocation2 + $0x60] sm:$0x1] (!%p2458_p1), %vm622_vm4, %v3096_v51  ;;  %v3310_v57 = vld [vmem:[%s3853_s4] sm:$0x3] (!%p2458_p1)  ;;  %v2566_v1 = vunpack.c.l.bf16 (!%p2458_p1), %v2589_v61  ;;  %v2567_v2 = vunpack.c.h.bf16 (!%p2458_p1), %v2589_v61 }
  0x66   : > { %628 = vst.msk [vmem:[#allocation2 + $0x78] sm:$0x1] (!%p2458_p1), %vm622_vm4, %v3096_v51  ;;  %629 = vst.msk [vmem:[#allocation2 + $0x90] sm:$0x1] (!%p2458_p1), %vm622_vm4, %v3096_v51  ;;  %v3315_v60 = vld [vmem:[%s3853_s4 + $0xa] sm:$0x3] (!%p2458_p1)  ;;  %2969 = vmatprep.subr.msk.bf16.mxu1 (!%p2458_p1), %vm892_vm3, %v3310_v57 }
  0x67   : > { %630 = vst.msk [vmem:[#allocation2 + $0xa8] sm:$0x1] (!%p2458_p1), %vm622_vm4, %v3096_v51  ;;  %631 = vst.msk [vmem:[#allocation2 + $0xc0] sm:$0x1] (!%p2458_p1), %vm622_vm4, %v3096_v51  ;;  %v2590_v62 = vld [vmem:[%s3195_s29 + $0x18] sm:$0xff] (!%p2458_p1)   ;;  %p660_p3 = scmp.eq.s32.totalorder (!%p2458_p1), %s3069_s21, 1  ;;  %2974 = vmatprep.subr.msk.bf16.mxu0 (!%p2458_p1), %vm892_vm3, %v3315_v60 }
  0x68   : > { %632 = vst.msk [vmem:[#allocation2 + $0xd8] sm:$0x1] (!%p2458_p1), %vm622_vm4, %v3096_v51  ;;  %633 = vst.msk [vmem:[#allocation2 + $0x11] sm:$0x1] (!%p2458_p1), %vm622_vm4, %v3096_v51  ;;  %v2570_v3 = vunpack.c.l.bf16 (!%p2458_p1), %v2590_v62  ;;  %v2571_v4 = vunpack.c.h.bf16 (!%p2458_p1), %v2590_v62  ;;  %v2591_v5 = vld [vmem:[%s3195_s29 + $0x20] sm:$0xff] (!%p2458_p1)   ;;  %v2592_v6 = vld [vmem:[%s3195_s29 + $0x28] sm:$0xff] (!%p2458_p1)  }
  0x69   : > { %635 = vst.msk [vmem:[#allocation2 + $0x41] sm:$0x1] %vm622_vm4, %v3096_v51  ;;  %636 = vst.msk [vmem:[#allocation2 + $0x59] sm:$0x1] %vm622_vm4, %v3096_v51  ;;  %s652_s28 = scalar_select %p651_p2, 1, 0  ;;  %v2574_v9 = vunpack.c.l.bf16 %v2591_v5  ;;  %v2575_v10 = vunpack.c.h.bf16 %v2591_v5  ;;  %v2578_v11 = vunpack.c.l.bf16 %v2592_v6  ;;  %v2579_v13 = vunpack.c.h.bf16 %v2592_v6 }
  0x6a   : > { %637 = vst.msk [vmem:[#allocation2 + $0x71] sm:$0x1] %vm622_vm4, %v3096_v51  ;;  %638 = vst.msk [vmem:[#allocation2 + $0x89] sm:$0x1] %vm622_vm4, %v3096_v51  ;;  %v2593_v7 = vld [vmem:[%s3195_s29 + $0x30] sm:$0xff]   ;;  %v2594_v12 = vld [vmem:[%s3195_s29 + $0x38] sm:$0xff]  }
  0x6b   : > { %639 = vst.msk [vmem:[#allocation2 + $0xa1] sm:$0x1] %vm622_vm4, %v3096_v51  ;;  %640 = vst.msk [vmem:[#allocation2 + $0xb9] sm:$0x1] %vm622_vm4, %v3096_v51  ;;  %v653_v8 = vstv %s652_s28  ;;  %v2582_v14 = vunpack.c.l.bf16 %v2593_v7  ;;  %v2583_v15 = vunpack.c.h.bf16 %v2593_v7  ;;  %v2553_v16 = vld [vmem:[%s3213_s26] sm:$0xff]   ;;  %v2586_v19 = vunpack.c.l.bf16 %v2594_v12  ;;  %s3097_s1 = smov 124  }
  0x6c   : > { %641 = vst.msk [vmem:[#allocation2 + $0xd1] sm:$0x1] %vm622_vm4, %v3096_v51  ;;  %642 = vst.msk [vmem:[#allocation2 + $0xe9] sm:$0x1] %vm622_vm4, %v3096_v51  ;;  %vm654_vm6 = vcmp.eq.s32.totalorder %v653_v8, 1  ;;  %v2587_v20 = vunpack.c.h.bf16 %v2594_v12  ;;  %v2554_v21 = vunpack.c.l.bf16 %v2553_v16  ;;  %v2555_v22 = vunpack.c.h.bf16 %v2553_v16 }
  0x6d   : > { %702 = vst.msk [vmem:[#allocation2 + $0x19] sm:$0xff] %vm657_vm5, %v2558_v52  ;;  %703 = vst.msk [vmem:[#allocation2 + $0x21] sm:$0xff] %vm657_vm5, %v2559_v53  ;;  %s661_s16 = scalar_select %p660_p3, 1, 0  ;;  %v655_v17 = vsel %vm654_vm6, 0.0, %v2550_v63  ;;  %v656_v18 = vsel %vm654_vm6, 0.0, %v2551_v0 }
  0x6e   : > { %704 = vst.msk [vmem:[#allocation2 + $0x31] sm:$0xff] %vm657_vm5, %v2562_v58  ;;  %705 = vst.msk [vmem:[#allocation2 + $0x39] sm:$0xff] %vm657_vm5, %v2563_v59  ;;  %vm771_vm8 = vsmask.f32 7424  ;;  %v1556_v50 = vsel %vm892_vm3, %v3315_v60, 0  ;;  %vm1127_vm9 = vcmask 1046528  }
  0x6f   : > { %706 = vst.msk [vmem:[#allocation2 + $0x49] sm:$0xff] %vm657_vm5, %v2566_v1  ;;  %707 = vst.msk [vmem:[#allocation2 + $0x51] sm:$0xff] %vm657_vm5, %v2567_v2  ;;  %v662_v23 = vstv %s661_s16 }
  0x70   : > { %708 = vst.msk [vmem:[#allocation2 + $0x61] sm:$0xff] %vm657_vm5, %v2570_v3  ;;  %709 = vst.msk [vmem:[#allocation2 + $0x69] sm:$0xff] %vm657_vm5, %v2571_v4  ;;  %vm663_vm7 = vcmp.eq.s32.totalorder %v662_v23, 1 }
  0x71   : > { %710 = vst.msk [vmem:[#allocation2 + $0x79] sm:$0xff] %vm657_vm5, %v2574_v9  ;;  %711 = vst.msk [vmem:[#allocation2 + $0x81] sm:$0xff] %vm657_vm5, %v2575_v10  ;;  %v664_v32 = vsel %vm663_vm7, 0.0, %v2554_v21  ;;  %v665_v33 = vsel %vm663_vm7, 0.0, %v2555_v22 }
  0x72   : > { %712 = vst.msk [vmem:[#allocation2 + $0x91] sm:$0xff] %vm657_vm5, %v2578_v11  ;;  %658 = vst.msk [vmem:[#allocation2 + $0x1] sm:$0xff] %vm657_vm5, %v655_v17 }
  0x73   : > { %659 = vst.msk [vmem:[#allocation2 + $0x9] sm:$0xff] %vm657_vm5, %v656_v18  ;;  %713 = vst.msk [vmem:[#allocation2 + $0x99] sm:$0xff] %vm657_vm5, %v2579_v13 }
  0x74   : > { %714 = vst.msk [vmem:[#allocation2 + $0xa9] sm:$0xff] %vm657_vm5, %v2582_v14  ;;  %715 = vst.msk [vmem:[#allocation2 + $0xb1] sm:$0xff] %vm657_vm5, %v2583_v15  ;;  %v721_v24 = vld [vmem:[#allocation2 + $0x18] sm:$0xff]  ;;  %v722_v25 = vld [vmem:[#allocation2 + $0x20] sm:$0xff] }
  0x75   : > { %716 = vst.msk [vmem:[#allocation2 + $0xc1] sm:$0xff] %vm657_vm5, %v2586_v19  ;;  %v723_v26 = vld [vmem:[#allocation2 + $0x28] sm:$0x3]  ;;  %717 = vst.msk [vmem:[#allocation2 + $0xc9] sm:$0xff] %vm657_vm5, %v2587_v20  ;;  %v3349_v27 = vpack.c.bf16 %v722_v25, %v721_v24  ;;  %v724_v29 = vld [vmem:[#allocation2 + $0x30] sm:$0xff] }
  0x76   : > { %v3351_v28 = vpack.c.bf16 %v723_v26, %v723_v26  ;;  %v725_v30 = vld [vmem:[#allocation2 + $0x38] sm:$0xff]  ;;  %v726_v31 = vld [vmem:[#allocation2 + $0x40] sm:$0x3]  ;;  %v727_v36 = vld [vmem:[#allocation2 + $0x48] sm:$0xff]  ;;  %667 = vst.msk [vmem:[#allocation2 + $0xd9] sm:$0xff] %vm657_vm5, %v664_v32 }
  0x77   : > { %v3353_v34 = vpack.c.bf16 %v725_v30, %v724_v29  ;;  %v3355_v35 = vpack.c.bf16 %v726_v31, %v726_v31  ;;  %v728_v37 = vld [vmem:[#allocation2 + $0x50] sm:$0xff]  ;;  %v729_v38 = vld [vmem:[#allocation2 + $0x58] sm:$0x3]  ;;  %668 = vst.msk [vmem:[#allocation2 + $0xe1] sm:$0xff] %vm657_vm5, %v665_v33  ;;  %v785_v39 = vshrl.u32 %v3349_v27, 16  ;;  %v787_v40 = vshll.u32 %v3349_v27, 16 }
  0x78   : > { %v792_v41 = vshll.u32 %v3351_v28, 16  ;;  %v3362_v42 = vpack.c.bf16 %v728_v37, %v727_v36  ;;  %v730_v43 = vld [vmem:[#allocation2 + $0x60] sm:$0xff]  ;;  %v731_v44 = vld [vmem:[#allocation2 + $0x68] sm:$0xff]  ;;  %v3369_v56 = vpack.c.bf16 %v729_v38, %v729_v38  ;;  %v732_v0 = vld [vmem:[#allocation2 + $0x70] sm:$0x3]  ;;  %v1131_v23 = vrot.slane %v3349_v27, 1 }
  0x79   : > { %v797_v45 = vshrl.u32 %v3353_v34, 16  ;;  %v799_v46 = vshll.u32 %v3353_v34, 16  ;;  %v804_v48 = vshll.u32 %v3355_v35, 16  ;;  %v789_v51 = vrot.slane %v787_v40, 1  ;;  %v718_v53 = vld [vmem:[#allocation2] sm:$0xff]  ;;  %v733_v16 = vld [vmem:[#allocation2 + $0x78] sm:$0xff] }
  0x7a   : > { %v794_v52 = vrot.slane %v792_v41, 1  ;;  %v719_v54 = vld [vmem:[#allocation2 + $0x8] sm:$0xff]  ;;  %v720_v55 = vld [vmem:[#allocation2 + $0x10] sm:$0x3]  ;;  %v3371_v58 = vpack.c.bf16 %v731_v44, %v730_v43  ;;  %v809_v2 = vshrl.u32 %v3362_v42, 16  ;;  %v811_v60 = vshll.u32 %v3362_v42, 16 }
  0x7b   : > { %v801_v59 = vrot.slane %v799_v46, 1  ;;  %v806_v61 = vrot.slane %v804_v48, 1  ;;  %v3373_v62 = vpack.c.bf16 %v719_v54, %v718_v53  ;;  %v3375_v63 = vpack.c.bf16 %v720_v55, %v720_v55  ;;  %v2512_v15 = vld [vmem:[%s3853_s4 + $0xc] sm:$0x3]  ;;  %v734_v17 = vld [vmem:[#allocation2 + $0x80] sm:$0xff]  ;;  %v736_v32 = vld [vmem:[#allocation2 + $0x90] sm:$0xff] }
  0x7c   : > { %v790_v1 = vor.u32 %v789_v51, %v785_v39  ;;  %v816_v3 = vshll.u32 %v3369_v56, 16  ;;  %v813_v9 = vrot.slane %v811_v60, 1  ;;  %v3384_v11 = vpack.c.bf16 %v732_v0, %v732_v0  ;;  %v735_v30 = vld [vmem:[#allocation2 + $0x88] sm:$0x3]  ;;  %v737_v33 = vld [vmem:[#allocation2 + $0x98] sm:$0xff] }
  0x7d   : > { %v802_v4 = vor.u32 %v801_v59, %v797_v45  ;;  %v773_v5 = vshrl.u32 %v3373_v62, 16  ;;  %v775_v6 = vshll.u32 %v3373_v62, 16  ;;  %v780_v7 = vshll.u32 %v3375_v63, 16  ;;  %v738_v38 = vld [vmem:[#allocation2 + $0xa0] sm:$0x3]  ;;  %v739_v48 = vld [vmem:[#allocation2 + $0xa8] sm:$0xff] }
  0x7e   : > { %v795_v8 = vsel %vm771_vm8, %v790_v1, %v794_v52  ;;  %v818_v10 = vrot.slane %v816_v3, 1  ;;  %v814_v18 = vor.u32 %v813_v9, %v809_v2  ;;  %v821_v19 = vshrl.u32 %v3371_v58, 16  ;;  %v3415_v39 = vld [vmem:[%s3853_s4 + $0x4] sm:$0x3]  ;;  %v741_v60 = vld [vmem:[#allocation2 + $0xb8] sm:$0x3] }
  0x7f   : > { %2750 = vmatprep.mubr.msk.bf16.mxu0 %vm657_vm5, %v795_v8  ;;  %v3388_v12 = vsel %vm771_vm8, %v802_v4, %v806_v61  ;;  %v777_v13 = vrot.slane %v775_v6, 1  ;;  %v782_v14 = vrot.slane %v780_v7, 1  ;;  %v823_v20 = vshll.u32 %v3371_v58, 16 }
  0x80   : > { %2751 = vmatmul.mubr.msk.bf16.vlgmr.msra.gmra.mrb[0].mxu0 %vm657_vm5, %v3388_v12  ;;  %v828_v21 = vshll.u32 %v3384_v11, 16  ;;  %v1132_v24 = vrot.slane %v3351_v28, 1  ;;  %v3401_v25 = vsel %vm771_vm8, %v814_v18, %v818_v10  ;;  %v3404_v31 = vpack.c.bf16 %v734_v17, %v733_v16 }
  0x81   : > { %v778_v22 = vor.u32 %v777_v13, %v773_v5  ;;  %2767 = vmatpush3.bf16.msra.mxu0 %v1556_v50  ;;  %v825_v26 = vrot.slane %v823_v20, 1  ;;  %v1010_v37 = vsel %vm892_vm3, %v3310_v57, 0  ;;  %2754 = vmatprep.mubr.msk.bf16.mxu0 %vm657_vm5, %v3401_v25  ;;  %v759_v40 = vpack.c.bf16 %v735_v30, %v735_v30  ;;  %v740_v50 = vld [vmem:[#allocation2 + $0xb0] sm:$0xff]  ;;  %v2521_v13 = vld [vmem:[%s3853_s4 + $0xe] sm:$0x3] }
  0x82   : > { %v830_v29 = vrot.slane %v828_v21, 1  ;;  %2975 = vmatprep.subr.msk.bf16.mxu0 %vm892_vm3, %v2512_v15  ;;  %v3418_v41 = vpack.c.bf16 %v737_v33, %v736_v32  ;;  %v3426_v43 = vsel %vm1127_vm9, %v1131_v23, %v1132_v24  ;;  %v835_v44 = vshll.u32 %v3404_v31, 16 }
  0x83   : > { %v783_v36 = vsel %vm771_vm8, %v778_v22, %v782_v14  ;;  %v826_v28 = vor.u32 %v825_v26, %v821_v19  ;;  %v3429_v45 = vpack.c.bf16 %v738_v38, %v738_v38  ;;  %v1135_v51 = vrot.slane %v3355_v35, 1  ;;  %v744_v38 = vld [vmem:[#allocation2 + $0xd0] sm:$0x3] }
  0x84   : > { %2678 = vmatprep.mubr.msk.bf16.mxu1 %vm657_vm5, %v783_v36  ;;  %v847_v46 = vshll.u32 %v3418_v41, 16  ;;  %v1134_v52 = vrot.slane %v3353_v34, 1  ;;  %v833_v53 = vshrl.u32 %v3404_v31, 16  ;;  %v840_v54 = vshll.u32 %v759_v40, 16 }
  0x85   : > { %2679 = vmatmul.mubr.msk.bf16.vlgmr.msra.gmra.mrb[0].mxu1 %vm657_vm5, %v795_v8  ;;  %v3421_v57 = vsel %vm771_vm8, %v826_v28, %v830_v29  ;;  %v837_v55 = vrot.slane %v835_v44, 1  ;;  %v1137_v59 = vrot.slane %v3362_v42, 1  ;;  %v1138_v61 = vrot.slane %v3369_v56, 1  ;;  %v743_v28 = vld [vmem:[#allocation2 + $0xc8] sm:$0xff] }
  0x86   : > { %2695 = vmatpush3.bf16.msra.mxu1 %v1010_v37  ;;  %2682 = vmatprep.mubr.msk.bf16.mxu1 %vm657_vm5, %v3388_v12  ;;  %v3443_v0 = vpack.c.bf16 %v740_v50, %v739_v48  ;;  %v845_v1 = vshrl.u32 %v3418_v41, 16  ;;  %v849_v2 = vrot.slane %v847_v46, 1  ;;  %v852_v35 = vshll.u32 %v3429_v45, 16  ;;  %v742_v37 = vld [vmem:[#allocation2 + $0xc0] sm:$0xff] }
  0x87   : > { %2970 = vmatprep.subr.msk.bf16.mxu1 %vm892_vm3, %v3415_v39  ;;  %v3450_v3 = vsel %vm1127_vm9, %v1134_v52, %v1135_v51  ;;  %v842_v4 = vrot.slane %v840_v54, 1  ;;  %v1677_v5 = vsel %vm892_vm3, %v2512_v15, 0  ;;  %v838_v56 = vor.u32 %v837_v55, %v833_v53  ;;  %v2485_v52 = vld [vmem:[%s3853_s4 + $0x6] sm:$0x3]  ;;  %v2530_v54 = vld [vmem:[%s3853_s4 + $0x10] sm:$0x3] }
  0x88   : > { %2755 = vmatmul.mubr.msk.bf16.gmra.mrb[4].mxu0 %vm657_vm5, %v3421_v57  ;;  %v3456_v6 = vsel %vm1127_vm9, %v1137_v59, %v1138_v61  ;;  %v763_v7 = vpack.c.bf16 %v741_v60, %v741_v60  ;;  %v859_v8 = vshll.u32 %v3443_v0, 16  ;;  %v850_v9 = vor.u32 %v849_v2, %v845_v1 }
  0x89   : > { %2768 = vmatprep.mubr.msk.bf16.mxu0 %vm657_vm5, %v3426_v43  ;;  %v854_v10 = vrot.slane %v852_v35, 1  ;;  %v1140_v14 = vrot.slane %v3371_v58, 1  ;;  %v1141_v15 = vrot.slane %v3384_v11, 1  ;;  %v1143_v16 = vrot.slane %v3404_v31, 1 }
  0x8a   : > { %v1144_v17 = vrot.slane %v759_v40, 1  ;;  %v3470_v18 = vsel %vm771_vm8, %v838_v56, %v842_v4  ;;  %v857_v19 = vshrl.u32 %v3443_v0, 16  ;;  %v861_v20 = vrot.slane %v859_v8, 1  ;;  %v747_v4 = vld [vmem:[#allocation2 + $0xe8] sm:$0x3] }
  0x8b   : > { %v864_v21 = vshll.u32 %v763_v7, 16  ;;  %v3475_v22 = vsel %vm771_vm8, %v850_v9, %v854_v10  ;;  %v3480_v11 = vsel %vm1127_vm9, %v1140_v14, %v1141_v15  ;;  %v1146_v29 = vrot.slane %v3418_v41, 1 }
  0x8c   : > { %v862_v23 = vor.u32 %v861_v20, %v857_v19  ;;  %v3485_v26 = vsel %vm1127_vm9, %v1143_v16, %v1144_v17  ;;  %v1147_v30 = vrot.slane %v3429_v45, 1  ;;  %v1149_v33 = vrot.slane %v3443_v0, 1 }
  0x8d   : > { %2683 = vmatmul.mubr.msk.bf16.gmra.mrb[4].mxu1 %vm657_vm5, %v3401_v25  ;;  %v866_v24 = vrot.slane %v864_v21, 1  ;;  %v1150_v36 = vrot.slane %v763_v7, 1  ;;  %v3502_v44 = vpack.c.bf16 %v743_v28, %v742_v37  ;;  %v3504_v46 = vpack.c.bf16 %v744_v38, %v744_v38 }
  0x8e   : > { %2686 = vmatprep.mubr.msk.bf16.mxu1 %vm657_vm5, %v3421_v57  ;;  %v3500_v40 = vsel %vm1127_vm9, %v1146_v29, %v1147_v30  ;;  %v1177_v51 = vsel %vm892_vm3, %v3415_v39, 0  ;;  %v1809_v39 = vsel %vm892_vm3, %v2521_v13, 0  ;;  %v1128_v55 = vrot.slane %v3373_v62, 1 }
  0x8f   : > { %v3494_v32 = vsel %vm771_vm8, %v862_v23, %v866_v24  ;;  %v3509_v45 = vsel %vm1127_vm9, %v1149_v33, %v1150_v36  ;;  %v1549_v48 = vrot.slane %v3502_v44, 1  ;;  %v1550_v50 = vrot.slane %v3504_v46, 1 }
  0x90   : > { %2769 = vmatmul.mubr.msk.bf16.vlgmr.msra.gmra.mrb[0].mxu0 %vm657_vm5, %v3450_v3  ;;  %v1129_v59 = vrot.slane %v3375_v63, 1  ;;  %v746_v63 = vld [vmem:[#allocation2 + $0xe0] sm:$0xff]  ;;  %v1298_v1 = vsel %vm892_vm3, %v2485_v52, 0  ;;  %v1422_v60 = vshll.u32 %v3504_v46, 16 }
  0x91   : > { %2785 = vmatpush3.bf16.msra.mxu0 %v1677_v5  ;;  %2772 = vmatprep.mubr.msk.bf16.mxu0 %vm657_vm5, %v3456_v6  ;;  %v3525_v53 = vsel %vm1127_vm9, %v1549_v48, %v1550_v50 }
  0x92   : > { %2976 = vmatprep.subr.msk.bf16.mxu0 %vm892_vm3, %v2521_v13  ;;  %v1130_v61 = vsel %vm1127_vm9, %v1128_v55, %v1129_v59  ;;  %v1424_v56 = vrot.slane %v1422_v60, 1 }
  0x95   : > { %2687 = vmatmul.mubr.msk.bf16.gmra.mrb[8].mxu1 %vm657_vm5, %v3470_v18 }
  0x96   : > { %2690 = vmatprep.mubr.msk.bf16.mxu1 %vm657_vm5, %v3475_v22 }
  0x98   : > { %2773 = vmatmul.mubr.msk.bf16.gmra.mrb[4].mxu0 %vm657_vm5, %v3480_v11 }
  0x99   : > { %2776 = vmatprep.mubr.msk.bf16.mxu0 %vm657_vm5, %v3485_v26 }
  0x9d   : > { %2691 = vmatmul.mubr.msk.bf16.gmra.mrb[12].mxu1 %vm657_vm5, %v3494_v32 }
  0x9e   : > { %2696 = vmatprep.mubr.msk.bf16.mxu1 %vm657_vm5, %v3373_v62  ;;  %v745_v62 = vld [vmem:[#allocation2 + $0xd8] sm:$0xff] }
  0x9f   : > { %v766_v2 = vpack.c.bf16 %v746_v63, %v745_v62 }
  0xa0   : > { %2777 = vmatmul.mubr.msk.bf16.gmra.mrb[8].mxu0 %vm657_vm5, %v3500_v40 }
  0xa1   : > { %2780 = vmatprep.mubr.msk.bf16.mxu0 %vm657_vm5, %v3509_v45  ;;  %v1794_v7 = vshrl.u32 %v766_v2, 16 }
  0xa5   : > { %2697 = vmatmul.mubr.msk.bf16.vlgmr.msra.gmra.mrb[0].mxu1 %vm657_vm5, %v3349_v27 }
  0xa6   : > { %2713 = vmatpush3.bf16.msra.mxu1 %v1177_v51  ;;  %2700 = vmatprep.mubr.msk.bf16.mxu1 %vm657_vm5, %v3353_v34 }
  0xa7   : > { %2971 = vmatprep.subr.msk.bf16.mxu1 %vm892_vm3, %v2485_v52 }
  0xa8   : > { %2781 = vmatmul.mubr.msk.bf16.gmra.mrb[12].mxu0 %vm657_vm5, %v3525_v53 }
  0xa9   : > { %2786 = vmatprep.mubr.msk.bf16.mxu0 %vm657_vm5, %v3353_v34 }
  0xad   : > { %2701 = vmatmul.mubr.msk.bf16.gmra.mrb[4].mxu1 %vm657_vm5, %v3362_v42 }
  0xae   : > { %2704 = vmatprep.mubr.msk.bf16.mxu1 %vm657_vm5, %v3371_v58 }
  0xb0   : > { %2787 = vmatmul.mubr.msk.bf16.vlgmr.msra.gmra.mrb[0].mxu0 %vm657_vm5, %v3362_v42 }
  0xb1   : > { %2803 = vmatpush3.bf16.msra.mxu0 %v1809_v39  ;;  %2790 = vmatprep.mubr.msk.bf16.mxu0 %vm657_vm5, %v3371_v58 }
  0xb2   : > { %2977 = vmatprep.subr.msk.bf16.mxu0 %vm892_vm3, %v2530_v54 }
  0xb5   : > { %2705 = vmatmul.mubr.msk.bf16.gmra.mrb[8].mxu1 %vm657_vm5, %v3404_v31 }
  0xb6   : > { %2708 = vmatprep.mubr.msk.bf16.mxu1 %vm657_vm5, %v3418_v41 }
  0xb8   : > { %2791 = vmatmul.mubr.msk.bf16.gmra.mrb[4].mxu0 %vm657_vm5, %v3404_v31 }
  0xb9   : > { %2794 = vmatprep.mubr.msk.bf16.mxu0 %vm657_vm5, %v3418_v41 }
  0xbd   : > { %2709 = vmatmul.mubr.msk.bf16.gmra.mrb[12].mxu1 %vm657_vm5, %v3443_v0 }
  0xbe   : > { %2714 = vmatprep.mubr.msk.bf16.mxu1 %vm657_vm5, %v1130_v61 }
  0xc0   : > { %2795 = vmatmul.mubr.msk.bf16.gmra.mrb[8].mxu0 %vm657_vm5, %v3443_v0 }
  0xc1   : > { %2798 = vmatprep.mubr.msk.bf16.mxu0 %vm657_vm5, %v3502_v44 }
  0xc5   : > { %2715 = vmatmul.mubr.msk.bf16.vlgmr.msra.gmra.mrb[0].mxu1 %vm657_vm5, %v3426_v43  ;;  %v1935_v43 = vsel %vm892_vm3, %v2530_v54, 0 }
  0xc6   : > { %2731 = vmatpush3.bf16.msra.mxu1 %v1298_v1  ;;  %2718 = vmatprep.mubr.msk.bf16.mxu1 %vm657_vm5, %v3450_v3 }
  0xc7   : > { %2973 = vmatprep.subr.msk.bf16.mxu1 %vm892_vm3, %v3269_v47  ;;  %v1417_v47 = vshll.u32 %v3502_v44, 16 }
  0xc8   : > { %2799 = vmatmul.mubr.msk.bf16.gmra.mrb[12].mxu0 %vm657_vm5, %v766_v2 }
  0xc9   : > { %2804 = vmatprep.mubr.msk.bf16.mxu0 %vm657_vm5, %v3388_v12  ;;  %v1415_v12 = vshrl.u32 %v3502_v44, 16  ;;  %v1419_v35 = vrot.slane %v1417_v47, 1 }
  0xcb   : > { %v1420_v5 = vor.u32 %v1419_v35, %v1415_v12 }
  0xcd   : > { %2719 = vmatmul.mubr.msk.bf16.gmra.mrb[4].mxu1 %vm657_vm5, %v3456_v6  ;;  %v1425_v10 = vsel %vm771_vm8, %v1420_v5, %v1424_v56 }
  0xce   : > { %2722 = vmatprep.mubr.msk.bf16.mxu1 %vm657_vm5, %v3480_v11 }
  0xd0   : > { %2805 = vmatmul.mubr.msk.bf16.vlgmr.msra.gmra.mrb[0].mxu0 %vm657_vm5, %v3401_v25  ;;  %v767_v25 = vpack.c.bf16 %v747_v4, %v747_v4 }
  0xd1   : > { %2821 = vmatpush3.bf16.msra.mxu0 %v1935_v43  ;;  %2808 = vmatprep.mubr.msk.bf16.mxu0 %vm657_vm5, %v3421_v57  ;;  %v1796_v57 = vshll.u32 %v766_v2, 16 }
  0xd2   : > { %v1801_v9 = vshll.u32 %v767_v25, 16 }
  0xd3   : > { %v1798_v8 = vrot.slane %v1796_v57, 1 }
  0xd4   : > { %v1803_v14 = vrot.slane %v1801_v9, 1 }
  0xd5   : > { %2723 = vmatmul.mubr.msk.bf16.gmra.mrb[8].mxu1 %vm657_vm5, %v3485_v26  ;;  %v1799_v13 = vor.u32 %v1798_v8, %v1794_v7 }
  0xd6   : > { %2726 = vmatprep.mubr.msk.bf16.mxu1 %vm657_vm5, %v3500_v40 }
  0xd7   : > { %v1804_v15 = vsel %vm771_vm8, %v1799_v13, %v1803_v14 }
  0xd8   : > { %2809 = vmatmul.mubr.msk.bf16.gmra.mrb[4].mxu0 %vm657_vm5, %v3470_v18 }
  0xd9   : > { %2812 = vmatprep.mubr.msk.bf16.mxu0 %vm657_vm5, %v3475_v22 }
  0xdd   : > { %2727 = vmatmul.mubr.msk.bf16.gmra.mrb[12].mxu1 %vm657_vm5, %v3509_v45 }
  0xde   : > { %2732 = vmatprep.mubr.msk.bf16.mxu1 %vm657_vm5, %v3349_v27  ;;  %v1929_v27 = vrot.slane %v767_v25, 1 }
  0xe0   : > { %2813 = vmatmul.mubr.msk.bf16.gmra.mrb[8].mxu0 %vm657_vm5, %v3494_v32 }
  0xe1   : > { %2816 = vmatprep.mubr.msk.bf16.mxu0 %vm657_vm5, %v1425_v10 }
  0xe5   : > { %2733 = vmatmul.mubr.msk.bf16.vlgmr.msra.gmra.mrb[0].mxu1 %vm657_vm5, %v3353_v34 }
  0xe6   : > { %2839 = vmatpush3.bf16.msra.mxu1 %v3278_v49  ;;  %2736 = vmatprep.mubr.msk.bf16.mxu1 %vm657_vm5, %v3362_v42  ;;  %v1928_v49 = vrot.slane %v766_v2, 1 }
  0xe8   : > { %2817 = vmatmul.mubr.msk.bf16.gmra.mrb[12].mxu0 %vm657_vm5, %v1804_v15  ;;  %v1930_v34 = vsel %vm1127_vm9, %v1928_v49, %v1929_v27 }
  0xe9   : > { %2822 = vmatprep.mubr.msk.bf16.mxu0 %vm657_vm5, %v3450_v3 }
  0xed   : > { %2737 = vmatmul.mubr.msk.bf16.gmra.mrb[4].mxu1 %vm657_vm5, %v3371_v58 }
  0xee   : > { %2740 = vmatprep.mubr.msk.bf16.mxu1 %vm657_vm5, %v3404_v31 }
  0xf0   : > { %2823 = vmatmul.mubr.msk.bf16.vlgmr.msra.gmra.mrb[0].mxu0 %vm657_vm5, %v3456_v6 }
  0xf1   : > { %2826 = vmatprep.mubr.msk.bf16.mxu0 %vm657_vm5, %v3480_v11 }
  0xf5   : > { %2741 = vmatmul.mubr.msk.bf16.gmra.mrb[8].mxu1 %vm657_vm5, %v3418_v41 }
  0xf6   : > { %2744 = vmatprep.mubr.msk.bf16.mxu1 %vm657_vm5, %v3443_v0 }
  0xf8   : > { %2827 = vmatmul.mubr.msk.bf16.gmra.mrb[4].mxu0 %vm657_vm5, %v3485_v26 }
  0xf9   : > { %2830 = vmatprep.mubr.msk.bf16.mxu0 %vm657_vm5, %v3500_v40 }
  0xfd   : > { %2745 = vmatmul.mubr.msk.bf16.gmra.mrb[12].mxu1 %vm657_vm5, %v3502_v44 }
  0xfe   : > { %2758 = vmatprep.mubr.msk.bf16.mxu1 %vm657_vm5, %v3470_v18  ;;  %v3646_v18 = vld [vmem:[%s3854_s5] ss:$0 sm:$0xff] }
 0x100   : > { %2831 = vmatmul.mubr.msk.bf16.gmra.mrb[8].mxu0 %vm657_vm5, %v3509_v45 }
 0x101   : > { %2834 = vmatprep.mubr.msk.bf16.mxu0 %vm657_vm5, %v3525_v53 }
 0x105   : > { %2759 = vmatmul.mubr.msk.bf16.vlgmr.msra.gmra.mrb[8].mxu1 %vm657_vm5, %v3475_v22 }
 0x106   : > { %2762 = vmatprep.mubr.msk.bf16.mxu1 %vm657_vm5, %v3494_v32 }
 0x108   : > { %2835 = vmatmul.mubr.msk.bf16.gmra.mrb[12].mxu0 %vm657_vm5, %v1930_v34 }
 0x10d   : > { %2763 = vmatmul.mubr.msk.bf16.gmra.mrb[12].mxu1 %vm657_vm5, %v1425_v10 }
 0x1b8   : > { %v2734_v42 = vpop.f32.mrb[0].mxu1 }
 0x1b9   : > { %v1334_v58 = vpop.f32.mrb[1].mxu1 }
 0x1ba   : > { %v2735_v31 = vpop.f32.mrb[2].mxu1 }
 0x1bb   : > { %v1337_v41 = vpop.f32.mrb[3].mxu1 }
 0x1c0   : > { %v2738_v0 = vpop.f32.mrb[4].mxu1 }
 0x1c1   : > { %v1350_v3 = vpop.f32.mrb[5].mxu1 }
 0x1c2   : > { %v2739_v6 = vpop.f32.mrb[6].mxu1 }
 0x1c3   : > { %v1353_v16 = vpop.f32.mrb[7].mxu1  ;;  %v2824_v17 = vpop.f32.mrb[0].mxu0 }
 0x1c4   : > { %v2840_v19 = vadd.f32 %v2824_v17, %v2734_v42  ;;  %v1971_v20 = vpop.f32.mrb[1].mxu0  ;;  %v2098_v17 = vlaneseq }
 0x1c5   : > { %v2841_v21 = vadd.f32 %v1971_v20, %v1334_v58  ;;  %v2825_v22 = vpop.f32.mrb[2].mxu0  ;;  %v2073_v58 = vld [vmem:[#allocation3] sm:$0x1] }
 0x1c6   : > { %v2842_v11 = vadd.f32 %v2825_v22, %v2735_v31  ;;  %v1974_v23 = vpop.f32.mrb[3].mxu0  ;;  %v3649_v24 = vadd.f32 %v2840_v19, %v3646_v18  ;;  %v2074_v31 = vmul.f32 0.00390625, %v2073_v58  ;;  %v2083_v22 = vld [vmem:[%s3188_s18 + $0x10] sm:$0xff] }
 0x1c7   : > { %v2843_v26 = vadd.f32 %v1974_v23, %v1337_v41  ;;  %v3652_v29 = vadd.f32 %v2841_v21, %v3646_v18  ;;  %v2075_v41 = vld [vmem:[#allocation4] sm:$0x1] }
 0x1c8   : > { %2177 = vrot.lane.b32.xlu1 %v3649_v24, %s3097_s1  ;;  %v3659_v30 = vadd.f32 %v2842_v11, %v3646_v18  ;;  %v2081_v11 = vld [vmem:[%s3188_s18] sm:$0xff]  ;;  %v2091_v58 = vld [vmem:[%s3188_s18 + $0x50] sm:$0xff] }
 0x1c9   : > { %2173 = vrot.lane.b32.xlu0 %v3652_v29, %s3097_s1  ;;  %v3662_v32 = vadd.f32 %v2843_v26, %v3646_v18 }
 0x1cb   : > { %v2828_v33 = vpop.f32.mrb[4].mxu0 }
 0x1cc   : > { %v2844_v36 = vadd.f32 %v2828_v33, %v2738_v0  ;;  %v1987_v37 = vpop.f32.mrb[5].mxu0  ;;  %2179 = vrot.lane.b32.xlu1 %v3659_v30, %s3097_s1  ;;  %v2076_v0 = vmul.f32 0.00390625, %v2075_v41 }
 0x1cd   : > { %v2845_v28 = vadd.f32 %v1987_v37, %v1350_v3  ;;  %v2829_v38 = vpop.f32.mrb[6].mxu0  ;;  %2175 = vrot.lane.b32.xlu0 %v3662_v32, %s3097_s1  ;;  %v2077_v3 = vmul.f32 %v2074_v31, %v2074_v31  ;;  %v2082_v37 = vld [vmem:[%s3188_s18 + $0x8] sm:$0xff] }
 0x1ce   : > { %v3669_v40 = vadd.f32 %v2844_v36, %v3646_v18  ;;  %v2846_v44 = vadd.f32 %v2829_v38, %v2739_v6  ;;  %v1990_v46 = vpop.f32.mrb[7].mxu0  ;;  %v2084_v36 = vld [vmem:[%s3188_s18 + $0x18] sm:$0xff] }
 0x1cf   : > { %v2847_v45 = vadd.f32 %v1990_v46, %v1353_v16  ;;  %v3679_v50 = vadd.f32 %v2845_v28, %v3646_v18  ;;  %v2078_v6 = vsub.f32 %v2076_v0, %v2077_v3  ;;  %v2092_v3 = vld [vmem:[%s3188_s18 + $0x58] sm:$0xff] }
 0x1d0   : > { %v3672_v48 = vadd.f32 %v2846_v44, %v3646_v18 }
 0x1d1   : > { %2185 = vrot.lane.b32.xlu0 %v3669_v40, %s3097_s1  ;;  %v3682_v52 = vadd.f32 %v2847_v45, %v3646_v18  ;;  %v2079_v16 = vadd.f32 1e-05, %v2078_v6  ;;  %v2087_v45 = vld [vmem:[%s3188_s18 + $0x30] sm:$0xff] }
 0x1d2   : > { %2187 = vrot.lane.b32.xlu1 %v3672_v48, %s3097_s1 }
 0x1d3   : > { %v2832_v51 = vpop.f32.mrb[8].mxu0  ;;  %3037 = vrsqrt.f32 %v2079_v16 }
 0x1d4   : > { %v2003_v53 = vpop.f32.mrb[9].mxu0 }
 0x1d5   : > { %v2833_v39 = vpop.f32.mrb[10].mxu0  ;;  %2181 = vrot.lane.b32.xlu0 %v3679_v50, %s3097_s1 }
 0x1d6   : > { %v2006_v54 = vpop.f32.mrb[11].mxu0  ;;  %2183 = vrot.lane.b32.xlu1 %v3682_v52, %s3097_s1 }
 0x1d8   : > { %v2760_v55 = vpop.f32.mrb[8].mxu1 }
 0x1d9   : > { %v2848_v59 = vadd.f32 %v2832_v51, %v2760_v55  ;;  %v1498_v61 = vpop.f32.mrb[9].mxu1  ;;  %v2088_v51 = vld [vmem:[%s3188_s18 + $0x38] sm:$0xff] }
 0x1da   : > { %v2849_v62 = vadd.f32 %v2003_v53, %v1498_v61  ;;  %v2761_v63 = vpop.f32.mrb[10].mxu1 }
 0x1db   : > { %v3689_v1 = vadd.f32 %v2848_v59, %v3646_v18  ;;  %v2850_v2 = vadd.f32 %v2833_v39, %v2761_v63  ;;  %v1501_v43 = vpop.f32.mrb[11].mxu1  ;;  %v2836_v47 = vpop.f32.mrb[12].mxu0 }
 0x1dc   : > { %v2851_v12 = vadd.f32 %v2006_v54, %v1501_v43  ;;  %v2019_v35 = vpop.f32.mrb[13].mxu0  ;;  %v3697_v57 = vadd.f32 %v2849_v62, %v3646_v18  ;;  %v2085_v43 = vld [vmem:[%s3188_s18 + $0x20] sm:$0xff] }
 0x1dd   : > { %v3692_v60 = vadd.f32 %v2850_v2, %v3646_v18  ;;  %2193 = vrot.lane.b32.xlu0 %v3689_v1, %s3097_s1  ;;  %v2837_v4 = vpop.f32.mrb[14].mxu0  ;;  %v3038_v21 = vpop.eup %3037 }
 0x1de   : > { %v2022_v25 = vpop.f32.mrb[15].mxu0  ;;  %v3702_v56 = vadd.f32 %v2851_v12, %v3646_v18  ;;  %v2086_v12 = vld [vmem:[%s3188_s18 + $0x28] sm:$0xff] }
 0x1df   : > { %2195 = vrot.lane.b32.xlu1 %v3692_v60, %s3097_s1 }
 0x1e0   : > { %v2764_v5 = vpop.f32.mrb[12].mxu1 }
 0x1e1   : > { %v2852_v7 = vadd.f32 %v2836_v47, %v2764_v5  ;;  %2189 = vrot.lane.b32.xlu0 %v3697_v57, %s3097_s1  ;;  %v1514_v8 = vpop.f32.mrb[13].mxu1 }
 0x1e2   : > { %v2853_v9 = vadd.f32 %v2019_v35, %v1514_v8  ;;  %v2765_v10 = vpop.f32.mrb[14].mxu1 }
 0x1e3   : > { %v2854_v13 = vadd.f32 %v2837_v4, %v2765_v10  ;;  %2191 = vrot.lane.b32.xlu1 %v3702_v56, %s3097_s1  ;;  %v1517_v14 = vpop.f32.mrb[15].mxu1  ;;  %v3717_v34 = vadd.f32 %v2852_v7, %v3646_v18 }
 0x1e4   : > { %v3709_v15 = vadd.f32 %v2853_v9, %v3646_v18  ;;  %v2855_v49 = vadd.f32 %v2022_v25, %v1517_v14 }
 0x1e5   : > { %v3722_v42 = vadd.f32 %v2854_v13, %v3646_v18 }
 0x1e6   : > { %v3712_v27 = vadd.f32 %v2855_v49, %v3646_v18  ;;  %2197 = vrot.lane.b32.xlu0 %v3709_v15, %s3097_s1  ;;  %v2099_v18 = vshrl.u32 %v2098_v17, 7  ;;  %v2089_v17 = vld [vmem:[%s3188_s18 + $0x40] sm:$0xff] }
 0x1e8   : > { %2199 = vrot.lane.b32.xlu1 %v3712_v27, %s3097_s1  ;;  %v2100_v19 = vsub.s32 0, %v2099_v18 }
 0x1ea   : > { %2201 = vrot.lane.b32.xlu0 %v3717_v34, %s3097_s1  ;;  %v3728_v20 = vrot.slane %v2074_v31, %v2100_v19  ;;  %v3733_v26 = vrot.slane %v3038_v21, %v2100_v19 }
 0x1ec   : > { %2203 = vrot.lane.b32.xlu1 %v3722_v42, %s3097_s1  ;;  %v2105_v23 = vsub.f32 %v2083_v22, %v3728_v20  ;;  %v2103_v33 = vsub.f32 %v2081_v11, %v3728_v20  ;;  %v2106_v38 = vsub.f32 %v2084_v36, %v3728_v20  ;;  %v2104_v46 = vsub.f32 %v2082_v37, %v3728_v20  ;;  %v2090_v11 = vld [vmem:[%s3188_s18 + $0x48] sm:$0xff]  ;;  %v2093_v36 = vld [vmem:[%s3188_s18 + $0x60] sm:$0xff] }
 0x1ed   : > { %v2109_v61 = vsub.f32 %v2087_v45, %v3728_v20  ;;  %v2110_v2 = vsub.f32 %v2088_v51, %v3728_v20  ;;  %v2107_v25 = vsub.f32 %v2085_v43, %v3728_v20  ;;  %v2108_v9 = vsub.f32 %v2086_v12, %v3728_v20 }
 0x1ee   : > { %v2127_v28 = vmul.f32 %v3733_v26, %v2105_v23  ;;  %v2125_v44 = vmul.f32 %v3733_v26, %v2103_v33  ;;  %v2128_v39 = vmul.f32 %v3733_v26, %v2106_v38  ;;  %v2126_v59 = vmul.f32 %v3733_v26, %v2104_v46  ;;  %v2094_v38 = vld [vmem:[%s3188_s18 + $0x68] sm:$0xff] }
 0x1ef   : > { %v2131_v4 = vmul.f32 %v3733_v26, %v2109_v61  ;;  %v2132_v8 = vmul.f32 %v3733_v26, %v2110_v2  ;;  %v2130_v49 = vmul.f32 %v3733_v26, %v2108_v9  ;;  %v2113_v6 = vsub.f32 %v2091_v58, %v3728_v20  ;;  %v2096_v61 = vld [vmem:[%s3188_s18 + $0x78] sm:$0xff] }
 0x1f0   : > { %v2143_v53 = vmul.f32 %v2127_v28, %v3649_v24  ;;  %v2141_v55 = vmul.f32 %v2125_v44, %v3652_v29  ;;  %v2144_v24 = vmul.f32 %v2128_v39, %v3659_v30  ;;  %v2142_v35 = vmul.f32 %v2126_v59, %v3662_v32  ;;  %v2095_v39 = vld [vmem:[%s3188_s18 + $0x70] sm:$0xff] }
 0x1f1   : > { %v2147_v30 = vmul.f32 %v2131_v4, %v3669_v40  ;;  %v2129_v32 = vmul.f32 %v3733_v26, %v2107_v25  ;;  %v2148_v14 = vmul.f32 %v2132_v8, %v3672_v48  ;;  %v2146_v16 = vmul.f32 %v2130_v49, %v3682_v52 }
 0x1f2   : > { %v2114_v21 = vsub.f32 %v2092_v3, %v3728_v20  ;;  %v2111_v23 = vsub.f32 %v2089_v17, %v3728_v20  ;;  %v2112_v33 = vsub.f32 %v2090_v11, %v3728_v20  ;;  %v2115_v46 = vsub.f32 %v2093_v36, %v3728_v20 }
 0x1f3   : > { %v2145_v40 = vmul.f32 %v2129_v32, %v3679_v50  ;;  %v2135_v50 = vmul.f32 %v3733_v26, %v2113_v6  ;;  %v2117_v2 = vsub.f32 %v2095_v39, %v3728_v20 }
 0x1f4   : > { %v2136_v52 = vmul.f32 %v3733_v26, %v2114_v21  ;;  %v2133_v28 = vmul.f32 %v3733_v26, %v2111_v23 }
 0x1f5   : > { %v2151_v37 = vmul.f32 %v2135_v50, %v3689_v1 }
 0x1f6   : > { %v2152_v51 = vmul.f32 %v2136_v52, %v3692_v60  ;;  %v2149_v59 = vmul.f32 %v2133_v28, %v3697_v57 }
 0x23a   : > { %v2178_v54 = vpop.permute.xlu1 %2177 }
 0x23b   : > { %v2223_v62 = vadd.f32 %v2178_v54, %v2143_v53  ;;  %v2174_v63 = vpop.permute.xlu0 %2173  ;;  %v2134_v53 = vmul.f32 %v3733_v26, %v2112_v33 }
 0x23c   : > { %v2221_v47 = vadd.f32 %v2174_v63, %v2141_v55  ;;  %v2116_v55 = vsub.f32 %v2094_v38, %v3728_v20  ;;  %v2137_v63 = vmul.f32 %v3733_v26, %v2115_v46 }
 0x23d   : > { %2239 = vst.msk [vmem:[%s3201_s17 + $0x10] sm:$0xff] %vm657_vm5, %v2223_v62  ;;  %v2150_v43 = vmul.f32 %v2134_v53, %v3702_v56 }
 0x23e   : > { %2237 = vst.msk [vmem:[%s3201_s17] sm:$0xff] %vm657_vm5, %v2221_v47  ;;  %v2180_v29 = vpop.permute.xlu1 %2179  ;;  %v2138_v12 = vmul.f32 %v3733_v26, %v2116_v55 }
 0x23f   : > { %v2224_v5 = vadd.f32 %v2180_v29, %v2144_v24  ;;  %v2176_v7 = vpop.permute.xlu0 %2175  ;;  %v2118_v24 = vsub.f32 %v2096_v61, %v3728_v20  ;;  %v2153_v29 = vmul.f32 %v2137_v63, %v3709_v15 }
 0x240   : > { %v2222_v10 = vadd.f32 %v2176_v7, %v2142_v35  ;;  %v2139_v35 = vmul.f32 %v3733_v26, %v2117_v2  ;;  %v2154_v56 = vmul.f32 %v2138_v12, %v3712_v27 }
 0x241   : > { %2240 = vst.msk [vmem:[%s3201_s17 + $0x18] sm:$0xff] %vm657_vm5, %v2224_v5  ;;  %v2140_v5 = vmul.f32 %v3733_v26, %v2118_v24 }
 0x242   : > { %2238 = vst.msk [vmem:[%s3201_s17 + $0x8] sm:$0xff] %vm657_vm5, %v2222_v10  ;;  %v2155_v8 = vmul.f32 %v2139_v35, %v3717_v34 }
 0x243   : > { %v2186_v13 = vpop.permute.xlu0 %2185  ;;  %v2156_v10 = vmul.f32 %v2140_v5, %v3722_v42 }
 0x244   : > { %v2227_v31 = vadd.f32 %v2186_v13, %v2147_v30  ;;  %v2188_v41 = vpop.permute.xlu1 %2187 }
 0x245   : > { %v2228_v0 = vadd.f32 %v2188_v41, %v2148_v14 }
 0x246   : > { %2243 = vst.msk [vmem:[%s3201_s17 + $0x30] sm:$0xff] %vm657_vm5, %v2227_v31 }
 0x247   : > { %2244 = vst.msk [vmem:[%s3201_s17 + $0x38] sm:$0xff] %vm657_vm5, %v2228_v0  ;;  %v2182_v48 = vpop.permute.xlu0 %2181 }
 0x248   : > { %v2225_v18 = vadd.f32 %v2182_v48, %v2145_v40  ;;  %v2184_v19 = vpop.permute.xlu1 %2183 }
 0x249   : > { %v2226_v22 = vadd.f32 %v2184_v19, %v2146_v16 }
 0x24a   : > { %2241 = vst.msk [vmem:[%s3201_s17 + $0x20] sm:$0xff] %vm657_vm5, %v2225_v18 }
 0x24b   : > { %2242 = vst.msk [vmem:[%s3201_s17 + $0x28] sm:$0xff] %vm657_vm5, %v2226_v22 }
 0x24f   : > { %v2194_v44 = vpop.permute.xlu0 %2193 }
 0x250   : > { %v2231_v45 = vadd.f32 %v2194_v44, %v2151_v37 }
 0x251   : > { %v2196_v54 = vpop.permute.xlu1 %2195 }
 0x252   : > { %2247 = vst.msk [vmem:[%s3201_s17 + $0x50] sm:$0xff] %vm657_vm5, %v2231_v45  ;;  %v2232_v1 = vadd.f32 %v2196_v54, %v2152_v51 }
 0x253   : > { %v2190_v62 = vpop.permute.xlu0 %2189 }
 0x254   : > { %2248 = vst.msk [vmem:[%s3201_s17 + $0x58] sm:$0xff] %vm657_vm5, %v2232_v1  ;;  %v2229_v60 = vadd.f32 %v2190_v62, %v2149_v59 }
 0x255   : > { %v2192_v47 = vpop.permute.xlu1 %2191 }
 0x256   : > { %2245 = vst.msk [vmem:[%s3201_s17 + $0x40] sm:$0xff] %vm657_vm5, %v2229_v60  ;;  %v2230_v57 = vadd.f32 %v2192_v47, %v2150_v43 }
 0x258   : > { %2246 = vst.msk [vmem:[%s3201_s17 + $0x48] sm:$0xff] %vm657_vm5, %v2230_v57  ;;  %v2198_v4 = vpop.permute.xlu0 %2197 }
 0x259   : > { %v2233_v25 = vadd.f32 %v2198_v4, %v2153_v29 }
 0x25a   : > { %v2200_v7 = vpop.permute.xlu1 %2199 }
 0x25b   : > { %2249 = vst.msk [vmem:[%s3201_s17 + $0x60] sm:$0xff] %vm657_vm5, %v2233_v25  ;;  %v2234_v20 = vadd.f32 %v2200_v7, %v2154_v56 }
 0x25c   : > { %v2202_v9 = vpop.permute.xlu0 %2201 }
 0x25d   : > { %2250 = vst.msk [vmem:[%s3201_s17 + $0x68] sm:$0xff] %vm657_vm5, %v2234_v20  ;;  %v2235_v15 = vadd.f32 %v2202_v9, %v2155_v8 }
 0x25e   : > { %v2204_v30 = vpop.permute.xlu1 %2203 }
 0x25f   : > { %2251 = vst.msk [vmem:[%s3201_s17 + $0x70] sm:$0xff] %vm657_vm5, %v2235_v15  ;;  %v2236_v32 = vadd.f32 %v2204_v30, %v2156_v10 }
 0x261   : > { %2252 = vst.msk [vmem:[%s3201_s17 + $0x78] sm:$0xff] %vm657_vm5, %v2236_v32 }
 0x262 PF: > { %s16_s27 = sadd.s32 1, %s3093_s27   ;;  %s3865_s23 = sld [smem:[#allocation5_spill]] }
 0x263   : > { %p13_p4 = scmp.ge.s32.totalorder %s16_s27, 10   ;;  %s3866_s18 = sld [smem:[#allocation6_spill]] }
 0x264   : > { %s3867_s10 = sld [smem:[#allocation7_spill]]  ;;  %s3868_s26 = sld [smem:[#allocation8_spill]] }
 0x265   : > { %s3869_s21 = smov %s3081_s24  ;;  %s3870_s22 = smov %s3085_s25 }
 0x266   :  { %15 = sbr.rel (!%p13_p4) target bundleno = 5 (0x5), region = 105 }
 0x269   : > { %s3871_s24 = smov %s3866_s18 }
 0x26a   : > { %s3872_s25 = smov %s3867_s10 }

</bundles_post_ra>
